<compile_context>
chip_gen: v7x
topology: tpu7x:2x2x1
jax: 0.10.0
libtpu: 0.0.40
codegen_flags: <defaults>
</compile_context>

<pallas_src>
import functools

import jax
import jax.numpy as jnp
import numpy as np
from jax.experimental import pallas as pl
from jax.experimental.pallas import tpu as pltpu


def _round_up(n, m):
    return ((n + m - 1) // m) * m


# ----------------------------------------------------------------------------------------
# Kernel: one grid step == TG graphs (TG*P node rows, block-diagonal adjacency tile).
# ----------------------------------------------------------------------------------------
def graphsage_step_kernel(a_ref, x_ref, wl1_ref, wr1_ref, b1_ref,
                          wl2_ref, wr2_ref, b2_ref, wlin_ref, blin_ref,
                          out_ref, *, tg, p):
    x = x_ref[...]        # (M, Cin_pad) bf16, M = tg*p node rows of this step
    a = a_ref[...]        # (M, M)       bf16 block-diag, row-normalized adjacency

    # ---- SAGEConv layer 1 (linearity reorder):  relu(A @ (X Wl1) + b1 + X Wr1) ----
    yl1 = jnp.dot(x, wl1_ref[...], preferred_element_type=jnp.float32)          # (M, H)
    yr1 = jnp.dot(x, wr1_ref[...], preferred_element_type=jnp.float32)          # (M, H)
    agg1 = jnp.dot(a, yl1.astype(jnp.bfloat16), preferred_element_type=jnp.float32)
    h1 = jnp.maximum(agg1 + yr1 + b1_ref[...], 0.0).astype(jnp.bfloat16)        # (M, H)

    # ---- SAGEConv layer 2 ----
    yl2 = jnp.dot(h1, wl2_ref[...], preferred_element_type=jnp.float32)
    yr2 = jnp.dot(h1, wr2_ref[...], preferred_element_type=jnp.float32)
    agg2 = jnp.dot(a, yl2.astype(jnp.bfloat16), preferred_element_type=jnp.float32)
    h2 = jnp.maximum(agg2 + yr2 + b2_ref[...], 0.0)                              # (M, H) f32

    # ---- global_mean_pool over the P contiguous rows of each of the TG graphs ----
    h_pad = h2.shape[-1]
    pooled = jnp.sum(h2.reshape(tg, p, h_pad), axis=1) * jnp.float32(1.0 / p)    # (TG, H)

    # ---- final Linear (classifier); (TG, c_pad) f32 store is sublane/lane dense ----
    out_ref[...] = (jnp.dot(pooled.astype(jnp.bfloat16), wlin_ref[...],
                            preferred_element_type=jnp.float32) + blin_ref[...])


# ----------------------------------------------------------------------------------------
# Plain-JAX glue: per-step block-diagonal adjacency + padded feature slabs + padded weights.
# ----------------------------------------------------------------------------------------
def build_step_operands(x, edge_index, num_graphs, nodes_per_graph, graphs_per_step, cin_pad):
    G, P, TG = num_graphs, nodes_per_graph, graphs_per_step
    N, C = x.shape
    m_tile = TG * P
    num_steps = _round_up(G, TG) // TG
    n_pad = num_steps * m_tile

    src, dst = edge_index[0], edge_index[1]

    # Block-diagonal adjacency: one (m_tile x m_tile) block per grid step, row-normalized.
    # Graphs are disjoint and contiguous, so every edge stays inside its step block.
    a = jnp.zeros((n_pad, m_tile), jnp.float32).at[dst, src % m_tile].add(1.0)
    deg = a.sum(axis=-1, keepdims=True)
    a = jnp.where(deg > 0, a / jnp.maximum(deg, 1.0), 0.0)

    # Node features, zero-padded to a lane multiple of channels and to n_pad rows.
    xp = jnp.zeros((n_pad, cin_pad), jnp.float32).at[:N, :C].set(x.astype(jnp.float32))

    return a.astype(jnp.bfloat16), xp.astype(jnp.bfloat16), num_steps, m_tile


def pack_params(params, cin_pad, h_pad, c_pad):
    def pad2(w, rows, cols, dtype):
        out = jnp.zeros((rows, cols), jnp.float32)
        out = out.at[:w.shape[0], :w.shape[1]].set(w.astype(jnp.float32))
        return out.astype(dtype)

    return (pad2(params["wl1"].T, cin_pad, h_pad, jnp.bfloat16),
            pad2(params["wr1"].T, cin_pad, h_pad, jnp.bfloat16),
            pad2(params["bl1"].reshape(1, -1), 1, h_pad, jnp.float32),
            pad2(params["wl2"].T, h_pad, h_pad, jnp.bfloat16),
            pad2(params["wr2"].T, h_pad, h_pad, jnp.bfloat16),
            pad2(params["bl2"].reshape(1, -1), 1, h_pad, jnp.float32),
            pad2(params["w_lin"].T, h_pad, c_pad, jnp.bfloat16),
            pad2(params["b_lin"].reshape(1, -1), 1, c_pad, jnp.float32))


def graphsage_forward(x, edge_index, batch, params, num_graphs, nodes_per_graph):
    G, P = num_graphs, nodes_per_graph
    in_ch = x.shape[1]
    num_classes = params["w_lin"].shape[0]

    cin_pad = _round_up(in_ch, 128)
    h_pad = _round_up(params["wl1"].shape[0], 128)
    c_pad = _round_up(num_classes, 128)

    # Graphs per step: aim for >= 128 node rows and a bf16-friendly (multiple of 16) sublane
    # extent.  TODO(synk): re-derive tile size per generation (128-wide MXU on v5e vs 256 on
    # v6e/v7x, 64 MiB VMEM ceiling on v7x) for very large Cin / P.
    tg = max(1, -(-128 // P))
    while (tg * P) % 16 != 0:
        tg += 1

    # Structural assumptions (PyG-style contiguous, equal-size batching; concrete inputs).
    # TODO(synk): ragged / non-contiguous batches need per-graph padding + a gather path.
    assert np.array_equal(np.asarray(batch), np.repeat(np.arange(G), P)), \
        "expected contiguous equal-size graph batching"
    ei_np = np.asarray(edge_index)
    assert np.all(ei_np[0] // P == ei_np[1] // P), "edge crosses a graph boundary"

    a_steps, x_steps, num_steps, m_tile = build_step_operands(
        x, edge_index, G, P, tg, cin_pad)
    wl1, wr1, b1, wl2, wr2, b2, wlin, blin = pack_params(params, cin_pad, h_pad, c_pad)

    def const2(shape):
        return pl.BlockSpec(shape, lambda s: (0, 0))

    grid_spec = pltpu.PrefetchScalarGridSpec(
        num_scalar_prefetch=0,
        grid=(num_steps,),
        in_specs=[
            pl.BlockSpec((m_tile, m_tile), lambda s: (s, 0)),    # block-diag adjacency tile
            pl.BlockSpec((m_tile, cin_pad), lambda s: (s, 0)),   # node-feature slab
            const2(wl1.shape), const2(wr1.shape), const2(b1.shape),
            const2(wl2.shape), const2(wr2.shape), const2(b2.shape),
            const2(wlin.shape), const2(blin.shape),
        ],
        out_specs=pl.BlockSpec((tg, c_pad), lambda s: (s, 0)),
    )

    kernel = functools.partial(graphsage_step_kernel, tg=tg, p=P)
    out = pl.pallas_call(
        kernel,
        out_shape=jax.ShapeDtypeStruct((num_steps * tg, c_pad), jnp.float32),
        grid_spec=grid_spec,
        compiler_params=pltpu.CompilerParams(
            dimension_semantics=("parallel",)),
    )(a_steps, x_steps, wl1, wr1, b1, wl2, wr2, b2, wlin, blin)

    logits = out[:G, :num_classes]
    return jnp.squeeze(logits)   # mirrors torch `.squeeze()`


# ----------------------------------------------------------------------------------------
# Pure-f32 JAX reference of the original PyG formulation (no reordering, no bf16).
# ----------------------------------------------------------------------------------------
def graphsage_reference(x, edge_index, batch, params, num_graphs):
    N = x.shape[0]
    src, dst = edge_index[0], edge_index[1]
    adj = jnp.zeros((N, N), jnp.float32).at[dst, src].add(1.0)
    deg = adj.sum(axis=1, keepdims=True)
    a = jnp.where(deg > 0, adj / jnp.maximum(deg, 1.0), 0.0)

    h = x.astype(jnp.float32)
    for wl, bl, wr in [(params["wl1"], params["bl1"], params["wr1"]),
                       (params["wl2"], params["bl2"], params["wr2"])]:
        h = jnp.maximum((a @ h) @ wl.T + bl + h @ wr.T, 0.0)

    counts = jnp.zeros((num_graphs,), jnp.float32).at[batch].add(1.0)
    pool = (jnp.arange(num_graphs)[:, None] == batch[None, :]).astype(jnp.float32)
    pool = pool / jnp.maximum(counts, 1.0)[:, None]
    pooled = pool @ h
    return jnp.squeeze(pooled @ params["w_lin"].T + params["b_lin"])


def init_params(key, in_channels, hidden_channels, num_classes):
    ks = jax.random.split(key, 8)
    s = 0.1
    return {
        "wl1": s * jax.random.normal(ks[0], (hidden_channels, in_channels), jnp.float32),
        "bl1": s * jax.random.normal(ks[1], (hidden_channels,), jnp.float32),
        "wr1": s * jax.random.normal(ks[2], (hidden_channels, in_channels), jnp.float32),
        "wl2": s * jax.random.normal(ks[3], (hidden_channels, hidden_channels), jnp.float32),
        "bl2": s * jax.random.normal(ks[4], (hidden_channels,), jnp.float32),
        "wr2": s * jax.random.normal(ks[5], (hidden_channels, hidden_channels), jnp.float32),
        "w_lin": s * jax.random.normal(ks[6], (num_classes, hidden_channels), jnp.float32),
        "b_lin": s * jax.random.normal(ks[7], (num_classes,), jnp.float32),
    }


if __name__ == "__main__":
    # Small synthetic problem: 32 graphs of 8 nodes (= 2 grid steps of 16 graphs / 128 rows),
    # in_channels=200 (pads to 256), hidden=16 (pads to 128), num_classes=1 (pads to 128).
    NUM_GRAPHS = 32
    NODES_PER_GRAPH = 8
    N = NUM_GRAPHS * NODES_PER_GRAPH
    IN_CH, HID, NUM_CLASSES = 200, 16, 1

    key = jax.random.PRNGKey(0)
    k_x, k_p = jax.random.split(key)

    x = jax.random.normal(k_x, (N, IN_CH), jnp.float32)

    # Deterministic undirected ring within each graph.
    edges = []
    for g in range(NUM_GRAPHS):
        base = g * NODES_PER_GRAPH
        for i in range(NODES_PER_GRAPH):
            j = (i + 1) % NODES_PER_GRAPH
            edges.append((base + i, base + j))
            edges.append((base + j, base + i))
    edge_index = jnp.asarray(edges, dtype=jnp.int32).T            # [2, E]
    batch = jnp.repeat(jnp.arange(NUM_GRAPHS, dtype=jnp.int32), NODES_PER_GRAPH)

    params = init_params(k_p, IN_CH, HID, NUM_CLASSES)

    out = graphsage_forward(x, edge_index, batch, params, NUM_GRAPHS, NODES_PER_GRAPH)
    out = jax.block_until_ready(out)

    ref = graphsage_reference(x, edge_index, batch, params, NUM_GRAPHS)
    assert out.shape == ref.shape == (NUM_GRAPHS,), (out.shape, ref.shape)
    assert jnp.allclose(out, ref, atol=5e-2, rtol=5e-2), (out, ref)

    print("KERNEL_OK")
</pallas_src>

<mosaic_0001>
module attributes {stable_mosaic.version = 11 : i64} {
  func.func @graphsage_step_kernel(%arg0: i32, %arg1: memref<128x128xbf16, #tpu.memory_space<vmem>>, %arg2: memref<128x256xbf16, #tpu.memory_space<vmem>>, %arg3: memref<256x128xbf16, #tpu.memory_space<vmem>>, %arg4: memref<256x128xbf16, #tpu.memory_space<vmem>>, %arg5: memref<1x128xf32, #tpu.memory_space<vmem>>, %arg6: memref<128x128xbf16, #tpu.memory_space<vmem>>, %arg7: memref<128x128xbf16, #tpu.memory_space<vmem>>, %arg8: memref<1x128xf32, #tpu.memory_space<vmem>>, %arg9: memref<128x128xbf16, #tpu.memory_space<vmem>>, %arg10: memref<1x128xf32, #tpu.memory_space<vmem>>, %arg11: memref<16x128xf32, #tpu.memory_space<vmem>>) attributes {dimension_semantics = [#tpu.dimension_semantics<parallel>], iteration_bounds = array<i64: 2>, scalar_prefetch = 0 : i64, scratch_operands = 0 : i64, tpu.core_type = #tpu.core_type<tc>, window_params = [{transform_indices = @transform_0, window_bounds = array<i64: 128, 128>}, {transform_indices = @transform_1, window_bounds = array<i64: 128, 256>}, {pipeline_mode = #tpu.pipeline_mode<synchronous>, transform_indices = @transform_2, window_bounds = array<i64: 256, 128>}, {pipeline_mode = #tpu.pipeline_mode<synchronous>, transform_indices = @transform_3, window_bounds = array<i64: 256, 128>}, {pipeline_mode = #tpu.pipeline_mode<synchronous>, transform_indices = @transform_4, window_bounds = array<i64: 1, 128>}, {pipeline_mode = #tpu.pipeline_mode<synchronous>, transform_indices = @transform_5, window_bounds = array<i64: 128, 128>}, {pipeline_mode = #tpu.pipeline_mode<synchronous>, transform_indices = @transform_6, window_bounds = array<i64: 128, 128>}, {pipeline_mode = #tpu.pipeline_mode<synchronous>, transform_indices = @transform_7, window_bounds = array<i64: 1, 128>}, {pipeline_mode = #tpu.pipeline_mode<synchronous>, transform_indices = @transform_8, window_bounds = array<i64: 128, 128>}, {pipeline_mode = #tpu.pipeline_mode<synchronous>, transform_indices = @transform_9, window_bounds = array<i64: 1, 128>}, {transform_indices = @transform_10, window_bounds = array<i64: 16, 128>}]} {
    %c0 = arith.constant 0 : index
    %c0_0 = arith.constant 0 : index
    %0 = vector.load %arg2[%c0, %c0_0] : memref<128x256xbf16, #tpu.memory_space<vmem>>, vector<128x256xbf16>
    %c0_1 = arith.constant 0 : index
    %c0_2 = arith.constant 0 : index
    %1 = vector.load %arg1[%c0_1, %c0_2] : memref<128x128xbf16, #tpu.memory_space<vmem>>, vector<128x128xbf16>
    %c0_3 = arith.constant 0 : index
    %c0_4 = arith.constant 0 : index
    %2 = vector.load %arg3[%c0_3, %c0_4] : memref<256x128xbf16, #tpu.memory_space<vmem>>, vector<256x128xbf16>
    %cst = arith.constant dense<0.000000e+00> : vector<128x128xf32>
    %3 = tpu.matmul %0, %2, %cst {dimension_numbers = #tpu.dot_dimension_numbers<[1], [0], [0], [1], [0, 0, 1, 1], [], []>} : vector<128x256xbf16>, vector<256x128xbf16>, vector<128x128xf32> -> vector<128x128xf32>
    %c0_5 = arith.constant 0 : index
    %c0_6 = arith.constant 0 : index
    %4 = vector.load %arg4[%c0_5, %c0_6] : memref<256x128xbf16, #tpu.memory_space<vmem>>, vector<256x128xbf16>
    %cst_7 = arith.constant dense<0.000000e+00> : vector<128x128xf32>
    %5 = tpu.matmul %0, %4, %cst_7 {dimension_numbers = #tpu.dot_dimension_numbers<[1], [0], [0], [1], [0, 0, 1, 1], [], []>} : vector<128x256xbf16>, vector<256x128xbf16>, vector<128x128xf32> -> vector<128x128xf32>
    %6 = arith.truncf %3 : vector<128x128xf32> to vector<128x128xbf16>
    %cst_8 = arith.constant dense<0.000000e+00> : vector<128x128xf32>
    %7 = tpu.matmul %1, %6, %cst_8 {dimension_numbers = #tpu.dot_dimension_numbers<[1], [0], [0], [1], [0, 0, 1, 1], [], []>} : vector<128x128xbf16>, vector<128x128xbf16>, vector<128x128xf32> -> vector<128x128xf32>
    %8 = arith.addf %7, %5 : vector<128x128xf32>
    %c0_9 = arith.constant 0 : index
    %c0_10 = arith.constant 0 : index
    %9 = vector.load %arg5[%c0_9, %c0_10] : memref<1x128xf32, #tpu.memory_space<vmem>>, vector<1x128xf32>
    %10 = vector.broadcast %9 : vector<1x128xf32> to vector<128x128xf32>
    %11 = arith.addf %8, %10 : vector<128x128xf32>
    %cst_11 = arith.constant 0.000000e+00 : f32
    %12 = vector.broadcast %cst_11 : f32 to vector<128x128xf32>
    %13 = arith.maximumf %11, %12 : vector<128x128xf32>
    %14 = arith.truncf %13 : vector<128x128xf32> to vector<128x128xbf16>
    %c0_12 = arith.constant 0 : index
    %c0_13 = arith.constant 0 : index
    %15 = vector.load %arg6[%c0_12, %c0_13] : memref<128x128xbf16, #tpu.memory_space<vmem>>, vector<128x128xbf16>
    %cst_14 = arith.constant dense<0.000000e+00> : vector<128x128xf32>
    %16 = tpu.matmul %14, %15, %cst_14 {dimension_numbers = #tpu.dot_dimension_numbers<[1], [0], [0], [1], [0, 0, 1, 1], [], []>} : vector<128x128xbf16>, vector<128x128xbf16>, vector<128x128xf32> -> vector<128x128xf32>
    %c0_15 = arith.constant 0 : index
    %c0_16 = arith.constant 0 : index
    %17 = vector.load %arg7[%c0_15, %c0_16] : memref<128x128xbf16, #tpu.memory_space<vmem>>, vector<128x128xbf16>
    %cst_17 = arith.constant dense<0.000000e+00> : vector<128x128xf32>
    %18 = tpu.matmul %14, %17, %cst_17 {dimension_numbers = #tpu.dot_dimension_numbers<[1], [0], [0], [1], [0, 0, 1, 1], [], []>} : vector<128x128xbf16>, vector<128x128xbf16>, vector<128x128xf32> -> vector<128x128xf32>
    %19 = arith.truncf %16 : vector<128x128xf32> to vector<128x128xbf16>
    %cst_18 = arith.constant dense<0.000000e+00> : vector<128x128xf32>
    %20 = tpu.matmul %1, %19, %cst_18 {dimension_numbers = #tpu.dot_dimension_numbers<[1], [0], [0], [1], [0, 0, 1, 1], [], []>} : vector<128x128xbf16>, vector<128x128xbf16>, vector<128x128xf32> -> vector<128x128xf32>
    %21 = arith.addf %20, %18 : vector<128x128xf32>
    %c0_19 = arith.constant 0 : index
    %c0_20 = arith.constant 0 : index
    %22 = vector.load %arg8[%c0_19, %c0_20] : memref<1x128xf32, #tpu.memory_space<vmem>>, vector<1x128xf32>
    %23 = vector.broadcast %22 : vector<1x128xf32> to vector<128x128xf32>
    %24 = arith.addf %21, %23 : vector<128x128xf32>
    %cst_21 = arith.constant 0.000000e+00 : f32
    %25 = vector.broadcast %cst_21 : f32 to vector<128x128xf32>
    %26 = arith.maximumf %24, %25 : vector<128x128xf32>
    %27 = vector.shape_cast %26 : vector<128x128xf32> to vector<16x8x128xf32>
    %cst_22 = arith.constant dense<0.000000e+00> : vector<16x128xf32>
    %28 = vector.multi_reduction <add>, %27, %cst_22 [1] : vector<16x8x128xf32> to vector<16x128xf32>
    %cst_23 = arith.constant 1.250000e-01 : f32
    %29 = vector.broadcast %cst_23 : f32 to vector<16x128xf32>
    %30 = arith.mulf %28, %29 : vector<16x128xf32>
    %31 = arith.truncf %30 : vector<16x128xf32> to vector<16x128xbf16>
    %c0_24 = arith.constant 0 : index
    %c0_25 = arith.constant 0 : index
    %32 = vector.load %arg9[%c0_24, %c0_25] : memref<128x128xbf16, #tpu.memory_space<vmem>>, vector<128x128xbf16>
    %cst_26 = arith.constant dense<0.000000e+00> : vector<16x128xf32>
    %33 = tpu.matmul %31, %32, %cst_26 {dimension_numbers = #tpu.dot_dimension_numbers<[1], [0], [0], [1], [0, 0, 1, 1], [], []>} : vector<16x128xbf16>, vector<128x128xbf16>, vector<16x128xf32> -> vector<16x128xf32>
    %c0_27 = arith.constant 0 : index
    %c0_28 = arith.constant 0 : index
    %34 = vector.load %arg10[%c0_27, %c0_28] : memref<1x128xf32, #tpu.memory_space<vmem>>, vector<1x128xf32>
    %35 = vector.broadcast %34 : vector<1x128xf32> to vector<16x128xf32>
    %36 = arith.addf %33, %35 : vector<16x128xf32>
    %c0_29 = arith.constant 0 : index
    %c0_30 = arith.constant 0 : index
    %37 = vector.load %arg11[%c0_29, %c0_30] : memref<16x128xf32, #tpu.memory_space<vmem>>, vector<16x128xf32>
    tpu.vector_store %arg11[%c0_29, %c0_30], %36 {strides = array<i32>} : memref<16x128xf32, #tpu.memory_space<vmem>>, vector<16x128xf32>,
    return
  }
  func.func @transform_0(%arg0: i32) -> (i32, i32) {
    %c0_i32 = arith.constant 0 : i32
    %c0_i32_0 = arith.constant 0 : i32
    return %arg0, %c0_i32 : i32, i32
  }
  func.func @transform_1(%arg0: i32) -> (i32, i32) {
    %c0_i32 = arith.constant 0 : i32
    %c0_i32_0 = arith.constant 0 : i32
    return %arg0, %c0_i32 : i32, i32
  }
  func.func @transform_2(%arg0: i32) -> (i32, i32) {
    %c0_i32 = arith.constant 0 : i32
    %c0_i32_0 = arith.constant 0 : i32
    %c0_i32_1 = arith.constant 0 : i32
    return %c0_i32, %c0_i32_0 : i32, i32
  }
  func.func @transform_3(%arg0: i32) -> (i32, i32) {
    %c0_i32 = arith.constant 0 : i32
    %c0_i32_0 = arith.constant 0 : i32
    %c0_i32_1 = arith.constant 0 : i32
    return %c0_i32, %c0_i32_0 : i32, i32
  }
  func.func @transform_4(%arg0: i32) -> (i32, i32) {
    %c0_i32 = arith.constant 0 : i32
    %c0_i32_0 = arith.constant 0 : i32
    %c0_i32_1 = arith.constant 0 : i32
    return %c0_i32, %c0_i32_0 : i32, i32
  }
  func.func @transform_5(%arg0: i32) -> (i32, i32) {
    %c0_i32 = arith.constant 0 : i32
    %c0_i32_0 = arith.constant 0 : i32
    %c0_i32_1 = arith.constant 0 : i32
    return %c0_i32, %c0_i32_0 : i32, i32
  }
  func.func @transform_6(%arg0: i32) -> (i32, i32) {
    %c0_i32 = arith.constant 0 : i32
    %c0_i32_0 = arith.constant 0 : i32
    %c0_i32_1 = arith.constant 0 : i32
    return %c0_i32, %c0_i32_0 : i32, i32
  }
  func.func @transform_7(%arg0: i32) -> (i32, i32) {
    %c0_i32 = arith.constant 0 : i32
    %c0_i32_0 = arith.constant 0 : i32
    %c0_i32_1 = arith.constant 0 : i32
    return %c0_i32, %c0_i32_0 : i32, i32
  }
  func.func @transform_8(%arg0: i32) -> (i32, i32) {
    %c0_i32 = arith.constant 0 : i32
    %c0_i32_0 = arith.constant 0 : i32
    %c0_i32_1 = arith.constant 0 : i32
    return %c0_i32, %c0_i32_0 : i32, i32
  }
  func.func @transform_9(%arg0: i32) -> (i32, i32) {
    %c0_i32 = arith.constant 0 : i32
    %c0_i32_0 = arith.constant 0 : i32
    %c0_i32_1 = arith.constant 0 : i32
    return %c0_i32, %c0_i32_0 : i32, i32
  }
  func.func @transform_10(%arg0: i32) -> (i32, i32) {
    %c0_i32 = arith.constant 0 : i32
    %c0_i32_0 = arith.constant 0 : i32
    return %arg0, %c0_i32 : i32, i32
  }
}

</mosaic_0001>

<bundles_post_ra>
// kernel: tpu_custom_call.1
= control target key start
LH: loop header
LB: loop body
LE: loop exit
PB: predicated region body
PF: predicated region fallthrough
CT: control target
= control target key end

     0   :  { %s3767_s0 = inlined_call_operand.hbm [shape: bf16[256,128], index: 0, kind: input, shape index: {}]   ;;  %s3768_s1 = inlined_call_operand.hbm [shape: bf16[256,256], index: 1, kind: input, shape index: {}]   ;;  %s3769_s2 = inlined_call_operand.hbm [shape: bf16[256,128], index: 2, kind: input, shape index: {}]   ;;  %s3770_s3 = inlined_call_operand.hbm [shape: bf16[256,128], index: 3, kind: input, shape index: {}]   ;;  %s3771_s4 = inlined_call_operand.vmem [shape: f32[1,128], index: 4, kind: input, shape index: {}]   ;;  %s3772_s5 = inlined_call_operand.hbm [shape: bf16[128,128], index: 5, kind: input, shape index: {}]   ;;  %s3773_s6 = inlined_call_operand.hbm [shape: bf16[128,128], index: 6, kind: input, shape index: {}]   ;;  %s3774_s7 = inlined_call_operand.vmem [shape: f32[1,128], index: 7, kind: input, shape index: {}]   ;;  %s3775_s8 = inlined_call_operand.hbm [shape: bf16[128,128], index: 8, kind: input, shape index: {}]   ;;  %s3776_s9 = inlined_call_operand.vmem [shape: f32[1,128], index: 9, kind: input, shape index: {}]   ;;  %s3777_s10 = inlined_call_operand.hbm [shape: f32[32,128], index: 10, kind: output, shape index: {}]  }
   0x1   :  { %3784 = sst [smem:[#allocation21_spill]] %s3767_s0 }
   0x2   :  { %3785 = sst [smem:[#allocation22_spill]] %s3769_s2 }
   0x3   :  { %3786 = sst [smem:[#allocation23_spill]] %s3770_s3 }
   0x4   :  { %3787 = sst [smem:[#allocation24_spill]] %s3772_s5 }
   0x5   :  { %3788 = sst [smem:[#allocation25_spill]] %s3773_s6 }
   0x6   :  { %3789 = sst [smem:[#allocation26_spill]] %s3775_s8 }
   0x7   :  { %3790 = sst [smem:[#allocation27_spill]] %s3776_s9 }
   0x8   :  { %3791 = sst [smem:[#allocation28_spill]] %s3777_s10 }
   0x9   :  { %15 = vsyncpa [#allocation3], 0 }
   0xa   :  { %17 = vsyncpa [#allocation3 + $0x1], 0 }
   0xb   :  { %18 = vsyncpa [#allocation6], 0 }
   0xc   :  { %20 = vsyncpa [#allocation6 + $0x1], 0 }
   0xd   :  { %21 = vsyncpa [#allocation9], 0 }
   0xe   :  { %22 = vsyncpa [#allocation12], 0 }
   0xf   :  { %23 = vsyncpa [#allocation4], 0 }
  0x10   :  { %25 = vsyncpa [#allocation4 + $0x1], 0  ;;  %s3227_s13 = smov 0   ;;  %s3229_s14 = smov 0  }
  0x11   :  { %s3231_s15 = smov 0   ;;  %s3233_s16 = smov 0  }
  0x12 LB: > { %s3156_s17 = smov [#allocation7]   ;;  %s3248_s19 = sadd.s32 4294967295, %s3154_s16   ;;  %s3154_s16 = sphi %s3233_s16, %s3824_s16   ;;  %s3150_s15 = sphi %s3231_s15, %s3823_s15   ;;  %s3146_s14 = sphi %s3229_s14, %s3822_s14   ;;  %s3142_s13 = sphi %s3227_s13, %s3821_s13  }
  0x13   : > { %s294_s18 = sshll.u32 %s3156_s17, 4  ;;  %p2178_p0 = scmp.ge.s32.totalorder %s3154_s16, 1  ;;  %s3253_s18 = int_to_ptr.vmem [resolvable:$true] %s294_s18 }
  0x14   : > { %p3779_p1 = scmp.eq.s32.totalorder %s3248_s19, 0  ;;  %p282_p2 = scmp.lt.s32.totalorder %s3154_s16, 3 }
  0x15   : > { %s3157_s21 = smov [#allocation8]   ;;  %s3158_s24 = smov [#allocation11]  }
  0x16   : > { %p3255_p3 = pnand %p2178_p0, %p282_p2  ;;  %s307_s22 = sshll.u32 %s3157_s21, 4  ;;  %s3268_s22 = int_to_ptr.vmem [resolvable:$true] %s307_s22 }
  0x17   : > { %s336_s25 = sshll.u32 %s3158_s24, 4  ;;  %s3794_s2 = sld [smem:[#allocation22_spill]]  ;;  %s3270_s25 = int_to_ptr.vmem [resolvable:$true] %s336_s25 }
  0x18   : > { %s3792_s20 = scalar_select %p3255_p3, 1, 0 }
  0x19   : > { %p2700_p5 = pneg %p3255_p3 }
  0x1b   : > { %p3264_p6 = pnand %p2700_p5, %p3779_p1 }
  0x1d   : > { %s2872_s28 = scalar_lea.hbm %s3794_s2, 2048  ;;  %p3280_p8 = pneg %p3264_p6 }
  0x1e   : > { %p2873_p7 = scmp.ne.s32.totalorder %s3794_s2, %s2872_s28  ;;  %p2879_p11 = scmp.lt.u32.totalorder %s2872_s28, %s3794_s2 }
  0x20   : > { %p2875_p9 = pnand %p3280_p8, %p2873_p7 }
  0x22   : > { %p2876_p10 = pneg %p2875_p9 }
  0x24   : > { %p2881_p12 = pnand %p2879_p11, %p2876_p10 }
  0x26   : > { %2884 = shalt.err (!%p2881_p12)
}
  0x27   : > { %s2885_s21 = scalar_lea.vmem %s3253_s18, 2048  ;;  %p2893_p5 = scmp.lt.s32.totalorder %s3253_s18, %s3253_s18 }
  0x28   : > { %p2886_p13 = scmp.ne.s32.totalorder %s3253_s18, %s2885_s21  ;;  %p2894_p4 = scmp.lt.s32.totalorder %s2885_s21, %s2885_s21 }
  0x2a   : > { %p2888_p0 = pnand %p2886_p13, %p3280_p8  ;;  %p2895_p7 = por %p2894_p4, %p2893_p5 }
  0x2c   : > { %p2889_p2 = pneg %p2888_p0 }
  0x2e   : > { %p2896_p9 = pnand %p2895_p7, %p2889_p2 }
  0x30   : > { %2899 = shalt.err (!%p2896_p9)
}
  0x31   : > { %s3781_s24 = smov 64   ;;  %s3782_s26 = smov 4  }
  0x32   : > { %2703 = dma.hbm_to_vmem [thread:$0]  (!%p3264_p6), %s3794_s2, 2048, %s3253_s18, [#allocation6], %s3781_s24, %s3781_s24, %s3782_s26  }
  0x33   : > { %s3796_s3 = sld [smem:[#allocation23_spill]] }
  0x39   : > { %s2900_s12 = scalar_lea.hbm %s3796_s3, 2048 }
  0x3a   : > { %p2901_p4 = scmp.ne.s32.totalorder %s3796_s3, %s2900_s12  ;;  %p2907_p12 = scmp.lt.u32.totalorder %s2900_s12, %s3796_s3 }
  0x3c   : > { %p2903_p10 = pnand %p2901_p4, %p3280_p8 }
  0x3e   : > { %p2904_p11 = pneg %p2903_p10 }
  0x40   : > { %p2909_p13 = pnand %p2907_p12, %p2904_p11 }
  0x42   : > { %2912 = shalt.err (!%p2909_p13)
}
  0x43   : > { %s2913_s18 = scalar_lea.vmem %s3268_s22, 2048  ;;  %p2921_p7 = scmp.lt.s32.totalorder %s3268_s22, %s3268_s22 }
  0x44   : > { %p2914_p0 = scmp.ne.s32.totalorder %s3268_s22, %s2913_s18  ;;  %p2922_p9 = scmp.lt.s32.totalorder %s2913_s18, %s2913_s18 }
  0x46   : > { %p2916_p2 = pnand %p2914_p0, %p3280_p8  ;;  %p2923_p4 = por %p2922_p9, %p2921_p7 }
  0x48   : > { %p2917_p5 = pneg %p2916_p2 }
  0x4a   : > { %p2924_p10 = pnand %p2923_p4, %p2917_p5 }
  0x4c   : > { %2927 = shalt.err (!%p2924_p10)
}
  0x4d   : > { %2706 = dma.hbm_to_vmem [thread:$0]  (!%p3264_p6), %s3796_s3, 2048, %s3268_s22, [#allocation9], %s3781_s24, %s3781_s24, %s3782_s26  }
  0x4e   : > { %s3797_s6 = sld [smem:[#allocation25_spill]] }
  0x54   : > { %s2928_s29 = scalar_lea.hbm %s3797_s6, 1024 }
  0x55   : > { %p2929_p11 = scmp.ne.s32.totalorder %s3797_s6, %s2928_s29  ;;  %p2935_p0 = scmp.lt.u32.totalorder %s2928_s29, %s3797_s6 }
  0x57   : > { %p2931_p12 = pnand %p2929_p11, %p3280_p8 }
  0x59   : > { %p2932_p13 = pneg %p2931_p12 }
  0x5b   : > { %p2937_p2 = pnand %p2935_p0, %p2932_p13 }
  0x5d   : > { %2940 = shalt.err (!%p2937_p2)
}
  0x5e   : > { %s2941_s22 = scalar_lea.vmem %s3270_s25, 1024  ;;  %p2949_p4 = scmp.lt.s32.totalorder %s3270_s25, %s3270_s25 }
  0x5f   : > { %p2942_p5 = scmp.ne.s32.totalorder %s3270_s25, %s2941_s22  ;;  %p2950_p10 = scmp.lt.s32.totalorder %s2941_s22, %s2941_s22 }
  0x61   : > { %p2944_p7 = pnand %p2942_p5, %p3280_p8  ;;  %p2951_p11 = por %p2950_p10, %p2949_p4 }
  0x63   : > { %p2945_p9 = pneg %p2944_p7 }
  0x65   : > { %p2952_p12 = pnand %p2951_p11, %p2945_p9 }
  0x67   : > { %2955 = shalt.err (!%p2952_p12)
}
  0x68   : > { %2712 = dma.hbm_to_vmem [thread:$0]  (!%p3264_p6), %s3797_s6, 1024, %s3270_s25, [#allocation12], %s3781_s24, %s3781_s24, %s3782_s26  }
  0x69   : > { %s3161_s10 = smov [#allocation10]   ;;  %s3162_s28 = smov [#allocation13]  }
  0x6a   : > { %s323_s27 = sshll.u32 %s3161_s10, 4  ;;  %s352_s29 = sshll.u32 %s3162_s28, 4  ;;  %s324_s27 = int_to_ptr.vmem [resolvable:$true] %s323_s27  ;;  %s353_s29 = int_to_ptr.vmem [resolvable:$true] %s352_s29 }
  0x6b   : > { %s3798_s5 = sld [smem:[#allocation24_spill]] }
  0x71   : > { %s2956_s17 = scalar_lea.hbm %s3798_s5, 1024 }
  0x72   : > { %p2957_p13 = scmp.ne.s32.totalorder %s3798_s5, %s2956_s17  ;;  %p2963_p5 = scmp.lt.u32.totalorder %s2956_s17, %s3798_s5 }
  0x74   : > { %p2959_p0 = pnand %p2957_p13, %p3280_p8 }
  0x76   : > { %p2960_p2 = pneg %p2959_p0 }
  0x78   : > { %p2965_p7 = pnand %p2963_p5, %p2960_p2 }
  0x7a   : > { %2968 = shalt.err (!%p2965_p7)
}
  0x7b   : > { %s2969_s25 = scalar_lea.vmem %s324_s27, 1024  ;;  %p2977_p11 = scmp.lt.s32.totalorder %s324_s27, %s324_s27 }
  0x7c   : > { %p2970_p9 = scmp.ne.s32.totalorder %s324_s27, %s2969_s25  ;;  %p2978_p12 = scmp.lt.s32.totalorder %s2969_s25, %s2969_s25 }
  0x7e   : > { %p2972_p4 = pnand %p2970_p9, %p3280_p8  ;;  %p2979_p1 = por %p2978_p12, %p2977_p11 }
  0x80   : > { %p2973_p10 = pneg %p2972_p4 }
  0x82   : > { %p2980_p3 = pnand %p2979_p1, %p2973_p10 }
  0x84   : > { %2983 = shalt.err (!%p2980_p3)
}
  0x85   : > { %2709 = dma.hbm_to_vmem [thread:$0]  (!%p3264_p6), %s3798_s5, 1024, %s324_s27, [#allocation9], %s3781_s24, %s3781_s24, %s3782_s26  }
  0x86   : > { %s3799_s8 = sld [smem:[#allocation26_spill]] }
  0x8c   : > { %s2984_s30 = scalar_lea.hbm %s3799_s8, 1024 }
  0x8d   : > { %p2985_p1 = scmp.ne.s32.totalorder %s3799_s8, %s2984_s30  ;;  %p2991_p0 = scmp.lt.u32.totalorder %s2984_s30, %s3799_s8 }
  0x8f   : > { %p2987_p3 = pnand %p2985_p1, %p3280_p8 }
  0x91   : > { %p2988_p13 = pneg %p2987_p3 }
  0x93   : > { %p2993_p2 = pnand %p2991_p0, %p2988_p13 }
  0x95   : > { %2996 = shalt.err (!%p2993_p2)
}
  0x96   : > { %s2997_s18 = scalar_lea.vmem %s353_s29, 1024  ;;  %p3005_p4 = scmp.lt.s32.totalorder %s353_s29, %s353_s29 }
  0x97   : > { %p2998_p5 = scmp.ne.s32.totalorder %s353_s29, %s2997_s18  ;;  %p3006_p10 = scmp.lt.s32.totalorder %s2997_s18, %s2997_s18 }
  0x99   : > { %p3000_p7 = pnand %p2998_p5, %p3280_p8  ;;  %p3007_p11 = por %p3006_p10, %p3005_p4 }
  0x9b   : > { %p3001_p9 = pneg %p3000_p7 }
  0x9d   : > { %p3008_p12 = pnand %p3007_p11, %p3001_p9 }
  0x9f   : > { %3011 = shalt.err (!%p3008_p12)
}
  0xa0   : > { %2715 = dma.hbm_to_vmem [thread:$0]  (!%p3264_p6), %s3799_s8, 1024, %s353_s29, [#allocation12], %s3781_s24, %s3781_s24, %s3782_s26  }
  0xa1   : > { %s2177_s23 = sadd.s32 4294967294, %s3154_s16   ;;  %s3400_s11 = sadd.s32 1, %s3154_s16  }
  0xa2   : > { %s38_s2 = sadd.s32 1, %s3150_s15  ;;  %s35_s9 = ssub.s32 %s3154_s16, %s3400_s11 }
  0xa3   : > { %p45_p8 = scmp.ne.s32.totalorder %s3150_s15, %s3146_s14  ;;  %p36_p1 = scmp.eq.s32.totalorder %s35_s9, 0 }
  0xa4   : > { %p46_p3 = scmp.eq.s32.totalorder %s3154_s16, 0  ;;  %p51_p13 = scmp.ne.s32.totalorder %s3146_s14, %s3142_s13 }
  0xa5   : > { %p269_p0 = scmp.eq.s32.totalorder %s3248_s19, 1  ;;  %p3800_p5 = scmp.eq.s32.totalorder %s3248_s19, 0 }
  0xa6   : > { %s3412_s10 = scalar_select %p36_p1, %s3150_s15, %s38_s2  }
  0xa7   : > { %p47_p2 = por %p46_p3, %p45_p8  ;;  %p3416_p7 = por %p3800_p5, %p51_p13 }
  0xa8   : > { %p3420_p6 = por %p269_p0, %p45_p8  ;;  %p275_p9 = scmp.eq.s32.totalorder %s2177_s23, 1 }
  0xa9   : > { %p2732_p4 = scmp.lt.s32.totalorder %s3154_s16, 2  ;;  %s3426_s30 = sand.u32 1, %s3150_s15  }
  0xaa   : > { %s3802_s28 = scalar_select %p3420_p6, 1, 0 }
  0xab   : > { %p3428_p10 = por %p275_p9, %p51_p13  ;;  %s2185_s17 = sshll.u32 %s3426_s30, 6 }
  0xac   : > { %s2289_s21 = sshll.u32 %s3154_s16, 10  ;;  %s3804_s0 = sld [smem:[#allocation21_spill]] }
  0xad   : > { %s3803_s12 = scalar_select %p3428_p10, 1, 0 }
  0xae   : > { %s373_s25 = scalar_lea.vmem [#allocation2], %s2185_s17  ;;  %p3439_p11 = pnand %p2732_p4, %p47_p2 }
  0xaf   : > { %s380_s23 = sshll.u32 %s373_s25, 4  ;;  %s370_s24 = scalar_lea.sflag [#allocation3], %s3426_s30  ;;  %s3443_s23 = int_to_ptr.vmem [resolvable:$true] %s380_s23 }
  0xb0   : > { %p3014_p8 = pneg %p3439_p11 }
  0xb2   : > { %s3437_s27 = scalar_lea.hbm %s3804_s0, %s2289_s21  ;;  %s3017_s22 = scalar_lea.hbm %s3804_s0, 2048 }
  0xb3   : > { %s3012_s26 = scalar_lea.hbm %s3437_s27, 1024  ;;  %p3018_p13 = scmp.lt.u32.totalorder %s3437_s27, %s3804_s0 }
  0xb4   : > { %p3013_p12 = scmp.ne.s32.totalorder %s3437_s27, %s3012_s26  ;;  %p3019_p0 = scmp.lt.u32.totalorder %s3017_s22, %s3012_s26 }
  0xb5   : > { %p3021_p5 = scmp.lt.u32.totalorder %s3012_s26, %s3437_s27 }
  0xb6   : > { %p3015_p1 = pnand %p3014_p8, %p3013_p12  ;;  %p3020_p2 = por %p3019_p0, %p3018_p13 }
  0xb8   : > { %p3016_p3 = pneg %p3015_p1  ;;  %p3022_p9 = por %p3021_p5, %p3020_p2 }
  0xba   : > { %p3023_p4 = pnand %p3022_p9, %p3016_p3 }
  0xbc   : > { %3026 = shalt.err (!%p3023_p4)
}
  0xbd   : > { %s3027_s9 = scalar_lea.vmem %s3443_s23, 1024  ;;  %s3163_s17 = smov [#allocation2]  }
  0xbe   : > { %p3028_p12 = scmp.ne.s32.totalorder %s3443_s23, %s3027_s9  ;;  %s3032_s21 = sshll.u32 %s3163_s17, 4  ;;  %s3033_s21 = int_to_ptr.vmem [resolvable:$false] %s3032_s21 }
  0xbf   : > { %s3034_s18 = scalar_lea.vmem %s3033_s21, 2048  ;;  %p3035_p6 = scmp.lt.s32.totalorder %s3443_s23, %s3033_s21 }
  0xc0   : > { %p3030_p1 = pnand %p3028_p12, %p3014_p8  ;;  %p3036_p13 = scmp.lt.s32.totalorder %s3034_s18, %s3027_s9 }
  0xc2   : > { %p3031_p10 = pneg %p3030_p1  ;;  %p3037_p0 = por %p3036_p13, %p3035_p6 }
  0xc4   : > { %p3038_p2 = pnand %p3037_p0, %p3031_p10 }
  0xc6   : > { %3041 = shalt.err (!%p3038_p2)
}
  0xc7   : > { %s3806_s26 = smov 4   ;;  %s3807_s22 = smov 64  }
  0xc8   : > { %2719 = dma.hbm_to_vmem [thread:$0]  (!%p3439_p11), %s3437_s27, 1024, %s3443_s23, %s370_s24, %s3807_s22, %s3807_s22, %s3806_s26  }
  0xc9   : > { %s2188_s25 = sshll.u32 %s3426_s30, 7  ;;  %s2291_s17 = sshll.u32 %s3154_s16, 11 }
  0xca   : > { %s3482_s18 = scalar_lea.hbm %s3768_s1, %s2291_s17  ;;  %s394_s0 = scalar_lea.vmem [#allocation5], %s2188_s25 }
  0xcb   : > { %s402_s3 = sshll.u32 %s394_s0, 4  ;;  %s3808_s5 = sand.u32 1, %s3154_s16   ;;  %s3484_s3 = int_to_ptr.vmem [resolvable:$true] %s402_s3 }
  0xcc   : > { %s3488_s6 = scalar_lea.sflag [#allocation6], %s3808_s5  ;;  %s3042_s8 = scalar_lea.hbm %s3482_s18, 2048 }
  0xcd   : > { %p3043_p6 = scmp.ne.s32.totalorder %s3482_s18, %s3042_s8  ;;  %s3047_s27 = scalar_lea.hbm %s3768_s1, 4096 }
  0xce   : > { %p3048_p5 = scmp.lt.u32.totalorder %s3482_s18, %s3768_s1  ;;  %p3049_p9 = scmp.lt.u32.totalorder %s3047_s27, %s3042_s8 }
  0xcf   : > { %p3045_p10 = pnand %p3043_p6, %p3014_p8  ;;  %p3051_p12 = scmp.lt.u32.totalorder %s3042_s8, %s3482_s18 }
  0xd0   : > { %p3050_p4 = por %p3049_p9, %p3048_p5 }
  0xd1   : > { %p3046_p3 = pneg %p3045_p10 }
  0xd2   : > { %p3052_p1 = por %p3051_p12, %p3050_p4 }
  0xd4   : > { %p3053_p13 = pnand %p3052_p1, %p3046_p3 }
  0xd6   : > { %3056 = shalt.err (!%p3053_p13)
}
  0xd7   : > { %s3057_s0 = scalar_lea.vmem %s3484_s3, 2048  ;;  %s3164_s5 = smov [#allocation5]  }
  0xd8   : > { %p3058_p0 = scmp.ne.s32.totalorder %s3484_s3, %s3057_s0  ;;  %s3062_s22 = sshll.u32 %s3164_s5, 4  ;;  %s3063_s22 = int_to_ptr.vmem [resolvable:$false] %s3062_s22 }
  0xd9   : > { %s3064_s25 = scalar_lea.vmem %s3063_s22, 4096  ;;  %p3065_p10 = scmp.lt.s32.totalorder %s3484_s3, %s3063_s22 }
  0xda   : > { %p3060_p2 = pnand %p3058_p0, %p3014_p8  ;;  %p3066_p5 = scmp.lt.s32.totalorder %s3064_s25, %s3057_s0 }
  0xdc   : > { %p3061_p6 = pneg %p3060_p2  ;;  %p3067_p9 = por %p3066_p5, %p3065_p10 }
  0xde   : > { %p3068_p4 = pnand %p3067_p9, %p3061_p6 }
  0xe0   : > { %3071 = shalt.err (!%p3068_p4)
}
  0xe1   : > { %s3165_s8 = smov 128   ;;  %s3166_s17 = smov 8  }
  0xe2   : > { %2722 = dma.hbm_to_vmem [thread:$0]  (!%p3439_p11), %s3482_s18, 2048, %s3484_s3, %s3488_s6, %s3165_s8, %s3165_s8, %s3166_s17  }
  0xe3   : > { %p3809_p8 = scmp.ne.s32.totalorder %s3792_s20, 0 }
  0xe4   : > { %s3517_s9 = sand.u32 (!%p3809_p8), 1, %s3146_s14  }
  0xe5   : > { %414 = sbr.rel (%p3809_p8) target bundleno = 1524 (0x5f4), region = 60  ;;  %s2193_s21 = sshll.u32 (!%p3809_p8), %s3517_s9, 6 }
  0xe6   : > { %s417_s24 = scalar_lea.sflag (!%p3809_p8), [#allocation3], %s3517_s9  ;;  %s3521_s30 = scalar_lea.vmem (!%p3809_p8), [#allocation2], %s2193_s21 }
  0xec   : > { %3117 = dma.done.wait (%p3416_p7), %s417_s24, 1024  }
  0xed   : > { %3119 = vsyncadd (%p3416_p7), %s417_s24, 4294966272  ;;  %s425_s3 = sand.u32 1, %s3248_s19   ;;  %s2194_s6 = sshll.u32 %s3517_s9, 7 }
  0xee   : > { %s426_s20 = scalar_lea.sflag [#allocation6], %s425_s3  ;;  %s3529_s2 = scalar_lea.vmem [#allocation5], %s2194_s6 }
  0xef   : > { %3121 = dma.done.wait (%p3416_p7), %s426_s20, 2048  }
  0xf0   : > { %3123 = vsyncadd (%p3416_p7), %s426_s20, 4294965248  ;;  %p3810_p11 = scmp.eq.s32.totalorder %s3248_s19, 0 }
  0xf2   : > { %3125 = dma.done.wait (%p3810_p11), [#allocation6], 2048   ;;  %p3811_p3 = pmov %p3810_p11 }
  0xf4   : > { %3127 = vsyncadd (%p3811_p3), [#allocation6], 4294965248  ;;  %p3812_p12 = pmov %p3811_p3 }
  0xf5   : > { %p3813_p1 = pmov %p3811_p3 }
  0xf6   : > { %3129 = dma.done.wait (%p3812_p12), [#allocation9], 3072  }
  0xf7   : > { %3131 = vsyncadd (%p3813_p1), [#allocation9], 4294964224  ;;  %p3814_p13 = pmov %p3813_p1 }
  0xf8   : > { %p3815_p0 = pmov %p3813_p1 }
  0xf9   : > { %3133 = dma.done.wait (%p3814_p13), [#allocation12], 2048  }
  0xfa   : > { %3135 = vsyncadd (%p3815_p0), [#allocation12], 4294965248  ;;  %v2784_v0 = vld [vmem:[#allocation7 + $0x40] sm:$0xff]   ;;  %v2786_v2 = vld [vmem:[#allocation7 + $0x48] sm:$0xff]   ;;  %vm3168_vm0 = vmmov 0   ;;  %vm1906_vm1 = vcmask 1041409  }
  0xfb   : > { %v2785_v1 = vld [vmem:[#allocation7] sm:$0xff]   ;;  %2293 = vmatprep.subr.bf16.mxu0 %v2784_v0  ;;  %2642 = vmatprep.subr.bf16.mxu1 %v2784_v0  ;;  %v2787_v3 = vld [vmem:[#allocation7 + $0x8] sm:$0xff]   ;;  %v2788_v4 = vld [vmem:[#allocation7 + $0x50] sm:$0xff]   ;;  %vm1908_vm2 = vcmask 1042434   ;;  %vm1910_vm3 = vcmask 1043459   ;;  %vm1912_vm4 = vcmask 1044484  }
  0xfc   : > { %2294 = vmatpush3.bf16.msra.mxu0 %v2785_v1  ;;  %2650 = vmatpush3.bf16.msra.mxu1 %v2785_v1  ;;  %v2789_v5 = vld [vmem:[#allocation7 + $0x10] sm:$0xff]   ;;  %v2790_v6 = vld [vmem:[#allocation7 + $0x58] sm:$0xff]   ;;  %v2792_v8 = vld [vmem:[#allocation7 + $0x60] sm:$0xff]   ;;  %vm1914_vm5 = vcmask 1045509   ;;  %vm1916_vm6 = vcmask 1046534   ;;  %vm1918_vm7 = vcmask 1047559  }
  0xfd   : > { %2295 = vmatprep.subr.bf16.mxu0 %v2786_v2  ;;  %2643 = vmatprep.subr.bf16.mxu1 %v2786_v2  ;;  %v2791_v7 = vld [vmem:[#allocation7 + $0x18] sm:$0xff]   ;;  %v2793_v9 = vld [vmem:[#allocation7 + $0x20] sm:$0xff]   ;;  %v2794_v10 = vld [vmem:[#allocation7 + $0x68] sm:$0xff]   ;;  %s2200_s26 = sshll.u32 %s3517_s9, 4  ;;  %s3816_s22 = sld [smem:[#allocation27_spill]] }
  0xfe   : > { %v3548_v11 = vld [vmem:[%s3529_s2 + $0x4] ss:$8 sps:$4 sm:$0xff]   ;;  %v2796_v14 = vld [vmem:[#allocation7 + $0x70] sm:$0xff]   ;;  %v2798_v16 = vld [vmem:[#allocation7 + $0x78] sm:$0xff]   ;;  %s490_s25 = scalar_lea.vmem [#allocation14], %s2200_s26  ;;  %s2292_s17 = sshll.u32 %s3248_s19, 8 }
  0xff   : > { %v2795_v12 = vld [vmem:[#allocation7 + $0x28] sm:$0xff]   ;;  %767 = vmatprep.mubr.bf16.mxu0 %v3548_v11  ;;  %v2797_v15 = vld [vmem:[#allocation7 + $0x30] sm:$0xff]   ;;  %v2799_v17 = vld [vmem:[#allocation7 + $0x38] sm:$0xff]   ;;  %s2034_s8 = sshll.u32 %s490_s25, 4  ;;  %s2021_s6 = scalar_lea.sflag [#allocation4], %s3517_s9  ;;  %s3718_s8 = int_to_ptr.vmem [resolvable:$true] %s2034_s8 }
 0x100   : > { %2296 = vmatpush3.bf16.msra.mxu0 %v2787_v3  ;;  %2651 = vmatpush3.bf16.msra.mxu1 %v2787_v3  ;;  %v3551_v13 = vld [vmem:[%s3529_s2 + $0x44] ss:$8 sps:$4 sm:$0xff]   ;;  %v3556_v18 = vld [vmem:[%s3529_s2] ss:$8 sps:$4 sm:$0xff]   ;;  %v2803_v20 = vld [vmem:[%s3529_s2 + $0x14] ss:$8 sps:$4 sm:$0xff]  }
 0x101   : > { %2297 = vmatprep.subr.bf16.mxu0 %v2788_v4  ;;  %2644 = vmatprep.subr.bf16.mxu1 %v2788_v4  ;;  %v2824_v19 = vld [vmem:[#allocation8 + $0x40] sm:$0xff]   ;;  %v3563_v22 = vld [vmem:[%s3529_s2 + $0x54] ss:$8 sps:$4 sm:$0xff]   ;;  %v2826_v24 = vld [vmem:[#allocation8 + $0x48] sm:$0xff]   ;;  %s3072_s19 = scalar_lea.vmem %s3718_s8, 256  ;;  %p3818_p2 = scmp.ne.s32.totalorder %s3802_s28, 0 }
 0x102   : > { %799 = vmatprep.mubr.bf16.mxu1 %v3551_v13  ;;  %v3560_v21 = vld [vmem:[%s3529_s2 + $0x40] ss:$8 sps:$4 sm:$0xff]   ;;  %v2828_v26 = vld [vmem:[#allocation8 + $0x50] sm:$0xff]   ;;  %v2809_v29 = vld [vmem:[%s3529_s2 + $0x24] ss:$8 sps:$4 sm:$0xff]   ;;  %p3073_p7 = scmp.ne.s32.totalorder %s3718_s8, %s3072_s19  ;;  %s3169_s20 = smov [#allocation14]  }
 0x103   : > { %v2825_v23 = vld [vmem:[#allocation8] sm:$0xff]   ;;  %v2827_v25 = vld [vmem:[#allocation8 + $0x8] sm:$0xff]   ;;  %v2805_v27 = vld [vmem:[%s3529_s2 + $0x10] ss:$8 sps:$4 sm:$0xff]  }
 0x104   : > { %2298 = vmatpush3.bf16.msra.mxu0 %v2789_v5  ;;  %2652 = vmatpush3.bf16.msra.mxu1 %v2789_v5  ;;  %v2814_v28 = vld [vmem:[%s3529_s2 + $0x50] ss:$8 sps:$4 sm:$0xff]   ;;  %v2818_v30 = vld [vmem:[%s3529_s2 + $0x64] ss:$8 sps:$4 sm:$0xff]   ;;  %v2811_v34 = vld [vmem:[%s3529_s2 + $0x20] ss:$8 sps:$4 sm:$0xff]   ;;  %p3074_p6 = pnand %p3073_p7, %p3818_p2 }
 0x105   : > { %2299 = vmatprep.subr.bf16.mxu0 %v2790_v6  ;;  %2645 = vmatprep.subr.bf16.mxu1 %v2790_v6  ;;  %v2829_v31 = vld [vmem:[#allocation8 + $0x10] sm:$0xff]   ;;  %v2830_v32 = vld [vmem:[#allocation8 + $0x58] sm:$0xff]   ;;  %v2820_v35 = vld [vmem:[%s3529_s2 + $0x60] ss:$8 sps:$4 sm:$0xff]  }
 0x106   : > { %v2831_v33 = vld [vmem:[#allocation8 + $0x18] sm:$0xff]   ;;  %v2832_v40 = vld [vmem:[#allocation8 + $0x60] sm:$0xff]   ;;  %v2834_v42 = vld [vmem:[#allocation8 + $0x68] sm:$0xff]   ;;  %p3075_p10 = pneg %p3074_p6 }
 0x107   : > { %v2815_v36 = vld [vmem:[%s3529_s2 + $0x34] ss:$8 sps:$4 sm:$0xff]   ;;  %v2817_v38 = vld [vmem:[%s3529_s2 + $0x30] ss:$8 sps:$4 sm:$0xff]   ;;  %v2833_v41 = vld [vmem:[#allocation8 + $0x20] sm:$0xff]  }
 0x108   : > { %2300 = vmatpush3.bf16.msra.mxu0 %v2791_v7  ;;  %2653 = vmatpush3.bf16.msra.mxu1 %v2791_v7  ;;  %v2821_v37 = vld [vmem:[%s3529_s2 + $0x74] ss:$8 sps:$4 sm:$0xff]   ;;  %v2823_v39 = vld [vmem:[%s3529_s2 + $0x70] ss:$8 sps:$4 sm:$0xff]   ;;  %v2835_v43 = vld [vmem:[#allocation8 + $0x28] sm:$0xff]   ;;  %s3076_s2 = sshll.u32 %s3169_s20, 4  ;;  %s3077_s2 = int_to_ptr.vmem [resolvable:$false] %s3076_s2 }
 0x109   : > { %2301 = vmatprep.subr.bf16.mxu0 %v2792_v8  ;;  %2646 = vmatprep.subr.bf16.mxu1 %v2792_v8  ;;  %v2836_v44 = vld [vmem:[#allocation8 + $0x70] sm:$0xff]   ;;  %v2838_v46 = vld [vmem:[#allocation8 + $0x78] sm:$0xff]   ;;  %v3583_v48 = vld [vmem:[%s3521_s30] sm:$0xff]   ;;  %s3078_s29 = scalar_lea.vmem %s3077_s2, 512  ;;  %p3079_p5 = scmp.lt.s32.totalorder %s3718_s8, %s3077_s2 }
 0x10a   : > { %v2837_v45 = vld [vmem:[#allocation8 + $0x30] sm:$0xff]   ;;  %v2839_v47 = vld [vmem:[#allocation8 + $0x38] sm:$0xff]   ;;  %v2848_v49 = vld [vmem:[#allocation10] sm:$0xff]   ;;  %p3080_p9 = scmp.lt.s32.totalorder %s3078_s29, %s3072_s19 }
 0x10b   : > { %v2849_v50 = vld [vmem:[#allocation10 + $0x8] sm:$0xff]   ;;  %v2850_v51 = vld [vmem:[#allocation10 + $0x10] sm:$0xff]   ;;  %v2851_v52 = vld [vmem:[#allocation10 + $0x18] sm:$0xff]  }
 0x10c   : > { %2302 = vmatpush3.bf16.msra.mxu0 %v2793_v9  ;;  %2654 = vmatpush3.bf16.msra.mxu1 %v2793_v9  ;;  %v2852_v53 = vld [vmem:[#allocation10 + $0x20] sm:$0xff]   ;;  %v2855_v54 = vld [vmem:[#allocation10 + $0x28] sm:$0xff]   ;;  %v2858_v3 = vld [vmem:[#allocation10 + $0x30] sm:$0xff]   ;;  %p3081_p4 = por %p3080_p9, %p3079_p5 }
 0x10d   : > { %2303 = vmatprep.subr.bf16.mxu0 %v2794_v10  ;;  %2647 = vmatprep.subr.bf16.mxu1 %v2794_v10 }
 0x10e   : > { %p3082_p8 = pnand %p3081_p4, %p3075_p10 }
 0x110   : > { %2304 = vmatpush3.bf16.msra.mxu0 %v2795_v12  ;;  %2655 = vmatpush3.bf16.msra.mxu1 %v2795_v12 }
 0x111   : > { %2305 = vmatprep.subr.bf16.mxu0 %v2796_v14  ;;  %2648 = vmatprep.subr.bf16.mxu1 %v2796_v14 }
 0x114   : > { %2306 = vmatpush3.bf16.msra.mxu0 %v2797_v15  ;;  %2656 = vmatpush3.bf16.msra.mxu1 %v2797_v15 }
 0x115   : > { %2307 = vmatprep.subr.bf16.mxu0 %v2798_v16  ;;  %2649 = vmatprep.subr.bf16.mxu1 %v2798_v16 }
 0x118   : > { %2308 = vmatpush3.bf16.msra.mxu0 %v2799_v17  ;;  %2657 = vmatpush3.bf16.msra.mxu1 %v2799_v17 }
 0x119   : > { %2357 = vmatprep.subr.bf16.mxu1 %v2824_v19 }
 0x11b   : > { %768 = vmatmul.mubr.bf16.vlgmr.msra.gmra.mrb[0].mxu0 %v3556_v18  ;;  %800 = vmatmul.mubr.bf16.vlgmr.msra.gmra.mrb[0].mxu1 %v3560_v21 }
 0x11c   : > { %775 = vmatprep.mubr.bf16.mxu0 %v2803_v20  ;;  %807 = vmatprep.mubr.bf16.mxu1 %v3563_v22 }
 0x11d   : > { %2358 = vmatpush3.bf16.msra.mxu1 %v2825_v23 }
 0x11e   : > { %2359 = vmatprep.subr.bf16.mxu1 %v2826_v24 }
 0x121   : > { %2360 = vmatpush3.bf16.msra.mxu1 %v2827_v25 }
 0x122   : > { %2361 = vmatprep.subr.bf16.mxu1 %v2828_v26 }
 0x123   : > { %776 = vmatmul.mubr.bf16.gmra.mrb[4].mxu0 %v2805_v27  ;;  %808 = vmatmul.mubr.bf16.gmra.mrb[4].mxu1 %v2814_v28 }
 0x124   : > { %783 = vmatprep.mubr.bf16.mxu0 %v2809_v29  ;;  %815 = vmatprep.mubr.bf16.mxu1 %v2818_v30 }
 0x125   : > { %2362 = vmatpush3.bf16.msra.mxu1 %v2829_v31 }
 0x126   : > { %2363 = vmatprep.subr.bf16.mxu1 %v2830_v32 }
 0x129   : > { %2364 = vmatpush3.bf16.msra.mxu1 %v2831_v33 }
 0x12a   : > { %2365 = vmatprep.subr.bf16.mxu1 %v2832_v40 }
 0x12b   : > { %784 = vmatmul.mubr.bf16.gmra.mrb[8].mxu0 %v2811_v34  ;;  %816 = vmatmul.mubr.bf16.gmra.mrb[8].mxu1 %v2820_v35 }
 0x12c   : > { %791 = vmatprep.mubr.bf16.mxu0 %v2815_v36  ;;  %823 = vmatprep.mubr.bf16.mxu1 %v2821_v37 }
 0x12d   : > { %2366 = vmatpush3.bf16.msra.mxu1 %v2833_v41 }
 0x12e   : > { %2367 = vmatprep.subr.bf16.mxu1 %v2834_v42 }
 0x131   : > { %2368 = vmatpush3.bf16.msra.mxu1 %v2835_v43 }
 0x132   : > { %2369 = vmatprep.subr.bf16.mxu1 %v2836_v44 }
 0x133   : > { %792 = vmatmul.mubr.bf16.gmra.mrb[12].mxu0 %v2817_v38  ;;  %824 = vmatmul.mubr.bf16.gmra.mrb[12].mxu1 %v2823_v39 }
 0x134   : > { %992 = vmatprep.mubr.bf16.mxu1 %v3548_v11  ;;  %2510 = vmatprep.mubr.bf16.mxu0 %v3583_v48 }
 0x135   : > { %2370 = vmatpush3.bf16.msra.mxu1 %v2837_v45 }
 0x136   : > { %2371 = vmatprep.subr.bf16.mxu1 %v2838_v46 }
 0x139   : > { %2372 = vmatpush3.bf16.msra.mxu1 %v2839_v47 }
 0x13a   : > { %2526 = vmatprep.subr.bf16.mxu1 %v2848_v49 }
 0x13c   : > { %993 = vmatmul.mubr.bf16.vlgmr.msra.gmra.mrb[16].mxu1 %v3556_v18 }
 0x13d   : > { %1000 = vmatprep.mubr.bf16.mxu1 %v2803_v20  ;;  %2527 = vmatpush3.bf16.msra.mxu1 %v2848_v49  ;;  %v2853_v49 = vld [vmem:[#allocation11] sm:$0xff]  }
 0x13e   : > { %2528 = vmatprep.subr.bf16.mxu1 %v2849_v50 }
 0x141   : > { %2529 = vmatpush3.bf16.msra.mxu1 %v2849_v50  ;;  %v3588_v50 = vld [vmem:[%s3521_s30 + $0x8] sm:$0xff]  }
 0x142   : > { %2530 = vmatprep.subr.bf16.mxu1 %v2850_v51 }
 0x144   : > { %1001 = vmatmul.mubr.bf16.gmra.mrb[20].mxu1 %v2805_v27 }
 0x145   : > { %1008 = vmatprep.mubr.bf16.mxu1 %v2809_v29  ;;  %2531 = vmatpush3.bf16.msra.mxu1 %v2850_v51  ;;  %v3591_v51 = vld [vmem:[%s3521_s30 + $0x10] sm:$0xff]  }
 0x146   : > { %2532 = vmatprep.subr.bf16.mxu1 %v2851_v52 }
 0x149   : > { %2533 = vmatpush3.bf16.msra.mxu1 %v2851_v52  ;;  %v2854_v52 = vld [vmem:[#allocation11 + $0x8] sm:$0xff]  }
 0x14a   : > { %2534 = vmatprep.subr.bf16.mxu1 %v2852_v53 }
 0x14c   : > { %1009 = vmatmul.mubr.bf16.gmra.mrb[24].mxu1 %v2811_v34 }
 0x14d   : > { %1016 = vmatprep.mubr.bf16.mxu1 %v2815_v36  ;;  %2535 = vmatpush3.bf16.msra.mxu1 %v2852_v53  ;;  %v2856_v53 = vld [vmem:[#allocation11 + $0x10] sm:$0xff]  }
 0x14e   : > { %2536 = vmatprep.subr.bf16.mxu1 %v2855_v54 }
 0x151   : > { %2537 = vmatpush3.bf16.msra.mxu1 %v2855_v54  ;;  %v3596_v54 = vld [vmem:[%s3521_s30 + $0x18] sm:$0xff]  }
 0x152   : > { %2538 = vmatprep.subr.bf16.mxu1 %v2858_v3 }
 0x154   : > { %1017 = vmatmul.mubr.bf16.gmra.mrb[28].mxu1 %v2817_v38 }
 0x155   : > { %1024 = vmatprep.mubr.bf16.mxu1 %v3551_v13  ;;  %2539 = vmatpush3.bf16.msra.mxu1 %v2858_v3 }
 0x15c   : > { %1025 = vmatmul.mubr.bf16.gmra.mrb[32].mxu1 %v3560_v21 }
 0x15d   : > { %1032 = vmatprep.mubr.bf16.mxu1 %v3563_v22 }
 0x164   : > { %1033 = vmatmul.mubr.bf16.gmra.mrb[36].mxu1 %v2814_v28 }
 0x165   : > { %1040 = vmatprep.mubr.bf16.mxu1 %v2818_v30 }
 0x16c   : > { %1041 = vmatmul.mubr.bf16.gmra.mrb[40].mxu1 %v2820_v35 }
 0x16d   : > { %1048 = vmatprep.mubr.bf16.mxu1 %v2821_v37 }
 0x174   : > { %1049 = vmatmul.mubr.bf16.gmra.mrb[44].mxu1 %v2823_v39 }
 0x1ee   : > { %v2309_v55 = vpop.f32.mrb[0].mxu0  ;;  %v2333_v56 = vpop.f32.mrb[0].mxu1 }
 0x1ef   : > { %v2310_v57 = vpop.f32.mrb[1].mxu0  ;;  %v2334_v58 = vpop.f32.mrb[1].mxu1 }
 0x1f0   : > { %v2311_v59 = vadd.f32 %v2310_v57, %v2309_v55  ;;  %v2312_v60 = vpop.f32.mrb[2].mxu0  ;;  %v2335_v61 = vadd.f32 %v2334_v58, %v2333_v56  ;;  %v2336_v62 = vpop.f32.mrb[2].mxu1  ;;  %v3599_v55 = vld [vmem:[%s3521_s30 + $0x20] sm:$0xff]   ;;  %v2857_v56 = vld [vmem:[#allocation11 + $0x18] sm:$0xff]   ;;  %v3604_v58 = vld [vmem:[%s3521_s30 + $0x28] sm:$0xff]  }
 0x1f1   : > { %v2313_v63 = vpop.f32.mrb[3].mxu0  ;;  %v2337_v0 = vpop.f32.mrb[3].mxu1  ;;  %v2859_v57 = vld [vmem:[#allocation11 + $0x20] sm:$0xff]  }
 0x1f2   : > { %v2314_v1 = vadd.f32 %v2313_v63, %v2312_v60  ;;  %v2338_v2 = vadd.f32 %v2337_v0, %v2336_v62  ;;  %v3612_v60 = vld [vmem:[%s3521_s30 + $0x38] sm:$0xff]  }
 0x1f4   : > { %v1057_v4 = vpack.c.bf16 %v2314_v1, %v2311_v59  ;;  %v1061_v5 = vpack.c.bf16 %v2338_v2, %v2335_v61  ;;  %v3607_v59 = vld [vmem:[%s3521_s30 + $0x30] sm:$0xff]   ;;  %s3817_s30 = sld [smem:[#allocation28_spill]] }
 0x1f6   : > { %v2315_v6 = vpop.f32.mrb[4].mxu0  ;;  %2494 = vmatprep.subr.bf16.mxu0 %v1057_v4  ;;  %v2339_v7 = vpop.f32.mrb[4].mxu1 }
 0x1f7   : > { %v2316_v8 = vpop.f32.mrb[5].mxu0  ;;  %2495 = vmatpush3.bf16.msra.mxu0 %v1057_v4  ;;  %v2340_v9 = vpop.f32.mrb[5].mxu1 }
 0x1f8   : > { %v2317_v10 = vadd.f32 %v2316_v8, %v2315_v6  ;;  %v2318_v11 = vpop.f32.mrb[6].mxu0  ;;  %v2341_v12 = vadd.f32 %v2340_v9, %v2339_v7  ;;  %v2342_v13 = vpop.f32.mrb[6].mxu1 }
 0x1f9   : > { %v2319_v14 = vpop.f32.mrb[7].mxu0  ;;  %v2343_v15 = vpop.f32.mrb[7].mxu1 }
 0x1fa   : > { %v2320_v16 = vadd.f32 %v2319_v14, %v2318_v11  ;;  %v2344_v17 = vadd.f32 %v2343_v15, %v2342_v13  ;;  %s3723_s3 = scalar_lea.hbm %s3817_s30, %s2292_s17 }
 0x1fc   : > { %v1058_v18 = vpack.c.bf16 %v2320_v16, %v2317_v10  ;;  %v1062_v19 = vpack.c.bf16 %v2344_v17, %v2341_v12 }
 0x1fe   : > { %v2321_v20 = vpop.f32.mrb[8].mxu0  ;;  %2496 = vmatprep.subr.bf16.mxu0 %v1058_v18  ;;  %v2345_v21 = vpop.f32.mrb[8].mxu1 }
 0x1ff   : > { %v2322_v22 = vpop.f32.mrb[9].mxu0  ;;  %2497 = vmatpush3.bf16.msra.mxu0 %v1058_v18  ;;  %v2346_v23 = vpop.f32.mrb[9].mxu1 }
 0x200   : > { %v2323_v24 = vadd.f32 %v2322_v22, %v2321_v20  ;;  %v2324_v25 = vpop.f32.mrb[10].mxu0  ;;  %v2347_v26 = vadd.f32 %v2346_v23, %v2345_v21  ;;  %v2348_v27 = vpop.f32.mrb[10].mxu1 }
 0x201   : > { %v2325_v28 = vpop.f32.mrb[11].mxu0  ;;  %v2349_v29 = vpop.f32.mrb[11].mxu1 }
 0x202   : > { %v2326_v30 = vadd.f32 %v2325_v28, %v2324_v25  ;;  %v2350_v31 = vadd.f32 %v2349_v29, %v2348_v27  ;;  %v2862_v28 = vld [vmem:[#allocation11 + $0x30] sm:$0xff]  }
 0x204   : > { %v1059_v32 = vpack.c.bf16 %v2326_v30, %v2323_v24  ;;  %v1063_v33 = vpack.c.bf16 %v2350_v31, %v2347_v26  ;;  %v2860_v26 = vld [vmem:[#allocation11 + $0x28] sm:$0xff]  }
 0x206   : > { %v2327_v34 = vpop.f32.mrb[12].mxu0  ;;  %2498 = vmatprep.subr.bf16.mxu0 %v1059_v32  ;;  %v2351_v35 = vpop.f32.mrb[12].mxu1 }
 0x207   : > { %v2328_v36 = vpop.f32.mrb[13].mxu0  ;;  %2499 = vmatpush3.bf16.msra.mxu0 %v1059_v32  ;;  %v2352_v37 = vpop.f32.mrb[13].mxu1  ;;  %v2861_v32 = vld [vmem:[#allocation10 + $0x38] sm:$0xff]  }
 0x208   : > { %v2329_v38 = vadd.f32 %v2328_v36, %v2327_v34  ;;  %v2330_v39 = vpop.f32.mrb[14].mxu0  ;;  %v2353_v40 = vadd.f32 %v2352_v37, %v2351_v35  ;;  %v2354_v41 = vpop.f32.mrb[14].mxu1  ;;  %v2863_v34 = vld [vmem:[#allocation11 + $0x38] sm:$0xff]   ;;  %2540 = vmatprep.subr.bf16.mxu1 %v2861_v32 }
 0x209   : > { %v2331_v42 = vpop.f32.mrb[15].mxu0  ;;  %v2355_v43 = vpop.f32.mrb[15].mxu1  ;;  %2541 = vmatpush3.bf16.msra.mxu1 %v2861_v32 }
 0x20a   : > { %v2332_v44 = vadd.f32 %v2331_v42, %v2330_v39  ;;  %v2356_v45 = vadd.f32 %v2355_v43, %v2354_v41 }
 0x20c   : > { %v1060_v46 = vpack.c.bf16 %v2332_v44, %v2329_v38  ;;  %v1064_v47 = vpack.c.bf16 %v2356_v45, %v2353_v40 }
 0x20e   : > { %2500 = vmatprep.subr.bf16.mxu0 %v1060_v46 }
 0x20f   : > { %2501 = vmatpush3.bf16.msra.mxu0 %v1060_v46  ;;  %v2373_v61 = vpop.f32.mrb[16].mxu1 }
 0x210   : > { %2502 = vmatprep.subr.bf16.mxu0 %v1061_v5  ;;  %v2374_v62 = vpop.f32.mrb[17].mxu1 }
 0x211   : > { %v2375_v63 = vadd.f32 %v2374_v62, %v2373_v61  ;;  %v2376_v0 = vpop.f32.mrb[18].mxu1 }
 0x212   : > { %v2377_v1 = vpop.f32.mrb[19].mxu1 }
 0x213   : > { %2503 = vmatpush3.bf16.msra.mxu0 %v1061_v5  ;;  %v3615_v2 = vadd.f32 %v2377_v1, %v2376_v0 }
 0x214   : > { %2504 = vmatprep.subr.bf16.mxu0 %v1062_v19 }
 0x217   : > { %2505 = vmatpush3.bf16.msra.mxu0 %v1062_v19  ;;  %v2379_v3 = vpop.f32.mrb[20].mxu1 }
 0x218   : > { %2506 = vmatprep.subr.bf16.mxu0 %v1063_v33  ;;  %v2380_v4 = vpop.f32.mrb[21].mxu1 }
 0x219   : > { %v2381_v5 = vadd.f32 %v2380_v4, %v2379_v3  ;;  %v2382_v6 = vpop.f32.mrb[22].mxu1 }
 0x21a   : > { %v2383_v7 = vpop.f32.mrb[23].mxu1 }
 0x21b   : > { %2507 = vmatpush3.bf16.msra.mxu0 %v1063_v33  ;;  %v2384_v8 = vadd.f32 %v2383_v7, %v2382_v6 }
 0x21c   : > { %2508 = vmatprep.subr.bf16.mxu0 %v1064_v47 }
 0x21f   : > { %2509 = vmatpush3.bf16.msra.mxu0 %v1064_v47  ;;  %v2385_v9 = vpop.f32.mrb[24].mxu1 }
 0x220   : > { %2558 = vmatprep.subr.bf16.mxu0 %v2853_v49  ;;  %v2386_v10 = vpop.f32.mrb[25].mxu1 }
 0x221   : > { %v3617_v11 = vadd.f32 %v2386_v10, %v2385_v9  ;;  %v2388_v12 = vpop.f32.mrb[26].mxu1 }
 0x222   : > { %2511 = vmatmul.mubr.bf16.vlgmr.msra.gmra.mrb[16].mxu0 %v3588_v50  ;;  %v2389_v13 = vpop.f32.mrb[27].mxu1 }
 0x223   : > { %2514 = vmatprep.mubr.bf16.mxu0 %v3591_v51  ;;  %2559 = vmatpush3.bf16.msra.mxu0 %v2853_v49  ;;  %v3619_v14 = vadd.f32 %v2389_v13, %v2388_v12 }
 0x224   : > { %2560 = vmatprep.subr.bf16.mxu0 %v2854_v52 }
 0x227   : > { %2561 = vmatpush3.bf16.msra.mxu0 %v2854_v52  ;;  %v2391_v15 = vpop.f32.mrb[28].mxu1 }
 0x228   : > { %2562 = vmatprep.subr.bf16.mxu0 %v2856_v53  ;;  %v2392_v16 = vpop.f32.mrb[29].mxu1 }
 0x229   : > { %v2393_v17 = vadd.f32 %v2392_v16, %v2391_v15  ;;  %v2394_v18 = vpop.f32.mrb[30].mxu1 }
 0x22a   : > { %2515 = vmatmul.mubr.bf16.gmra.mrb[20].mxu0 %v3596_v54  ;;  %v2395_v19 = vpop.f32.mrb[31].mxu1 }
 0x22b   : > { %2518 = vmatprep.mubr.bf16.mxu0 %v3599_v55  ;;  %2563 = vmatpush3.bf16.msra.mxu0 %v2856_v53  ;;  %v2396_v20 = vadd.f32 %v2395_v19, %v2394_v18  ;;  %v3638_v53 = vld [vmem:[%s3771_s4] ss:$0 sm:$0xff] }
 0x22c   : > { %2564 = vmatprep.subr.bf16.mxu0 %v2857_v56 }
 0x22f   : > { %2565 = vmatpush3.bf16.msra.mxu0 %v2857_v56  ;;  %v2397_v21 = vpop.f32.mrb[32].mxu1 }
 0x230   : > { %2566 = vmatprep.subr.bf16.mxu0 %v2859_v57  ;;  %v2398_v22 = vpop.f32.mrb[33].mxu1 }
 0x231   : > { %v3621_v23 = vadd.f32 %v2398_v22, %v2397_v21  ;;  %v2400_v24 = vpop.f32.mrb[34].mxu1 }
 0x232   : > { %2519 = vmatmul.mubr.bf16.gmra.mrb[24].mxu0 %v3604_v58  ;;  %v2401_v25 = vpop.f32.mrb[35].mxu1 }
 0x233   : > { %2522 = vmatprep.mubr.bf16.mxu0 %v3607_v59  ;;  %2567 = vmatpush3.bf16.msra.mxu0 %v2859_v57  ;;  %v3623_v27 = vadd.f32 %v2401_v25, %v2400_v24 }
 0x234   : > { %2568 = vmatprep.subr.bf16.mxu0 %v2860_v26 }
 0x237   : > { %2569 = vmatpush3.bf16.msra.mxu0 %v2860_v26  ;;  %v2403_v29 = vpop.f32.mrb[36].mxu1 }
 0x238   : > { %v2404_v30 = vpop.f32.mrb[37].mxu1  ;;  %2570 = vmatprep.subr.bf16.mxu0 %v2862_v28 }
 0x239   : > { %v2406_v31 = vpop.f32.mrb[38].mxu1  ;;  %v2405_v35 = vadd.f32 %v2404_v30, %v2403_v29 }
 0x23a   : > { %2523 = vmatmul.mubr.bf16.gmra.mrb[28].mxu0 %v3612_v60  ;;  %v2407_v33 = vpop.f32.mrb[39].mxu1 }
 0x23b   : > { %2571 = vmatpush3.bf16.msra.mxu0 %v2862_v28  ;;  %v3625_v36 = vadd.f32 %v2407_v33, %v2406_v31 }
 0x23c   : > { %2572 = vmatprep.subr.bf16.mxu0 %v2863_v34 }
 0x23f   : > { %2573 = vmatpush3.bf16.msra.mxu0 %v2863_v34  ;;  %v2409_v37 = vpop.f32.mrb[40].mxu1 }
 0x240   : > { %v2410_v38 = vpop.f32.mrb[41].mxu1 }
 0x241   : > { %v2412_v39 = vpop.f32.mrb[42].mxu1  ;;  %v3627_v41 = vadd.f32 %v2410_v38, %v2409_v37 }
 0x242   : > { %v2413_v40 = vpop.f32.mrb[43].mxu1 }
 0x243   : > { %v3629_v42 = vadd.f32 %v2413_v40, %v2412_v39 }
 0x247   : > { %v2415_v43 = vpop.f32.mrb[44].mxu1 }
 0x248   : > { %v2416_v44 = vpop.f32.mrb[45].mxu1 }
 0x249   : > { %v2418_v45 = vpop.f32.mrb[46].mxu1  ;;  %v3631_v46 = vadd.f32 %v2416_v44, %v2415_v43 }
 0x24a   : > { %v2419_v47 = vpop.f32.mrb[47].mxu1 }
 0x24b   : > { %v3633_v49 = vadd.f32 %v2419_v47, %v2418_v45 }
 0x2f5   : > { %v2512_v52 = vpop.f32.mrb[16].mxu0 }
 0x2f6   : > { %v1156_v56 = vadd.f32 %v2512_v52, %v2381_v5  ;;  %v1147_v57 = vpop.f32.mrb[17].mxu0 }
 0x2f7   : > { %v1148_v61 = vadd.f32 %v2375_v63, %v1147_v57  ;;  %v2513_v62 = vpop.f32.mrb[18].mxu0 }
 0x2f8   : > { %v1219_v0 = vadd.f32 %v3638_v53, %v1156_v56  ;;  %v1159_v1 = vadd.f32 %v2513_v62, %v2384_v8  ;;  %v1150_v3 = vpop.f32.mrb[19].mxu0 }
 0x2f9   : > { %v1217_v4 = vadd.f32 %v3638_v53, %v1148_v61  ;;  %v1151_v6 = vadd.f32 %v3615_v2, %v1150_v3 }
 0x2fa   : > { %v1220_v7 = vadd.f32 %v3638_v53, %v1159_v1  ;;  %v1235_v10 = vmax.f32 %v1219_v0, 0.0 }
 0x2fb   : > { %v1218_v9 = vadd.f32 %v3638_v53, %v1151_v6  ;;  %v1233_v13 = vmax.f32 %v1217_v4, 0.0 }
 0x2fc   : > { %v1236_v12 = vmax.f32 %v1220_v7, 0.0 }
 0x2fd   : > { %v1234_v15 = vmax.f32 %v1218_v9, 0.0  ;;  %v2516_v5 = vpop.f32.mrb[20].mxu0 }
 0x2fe   : > { %v1250_v16 = vpack.c.bf16 %v1236_v12, %v1235_v10  ;;  %v1172_v63 = vadd.f32 %v2516_v5, %v2393_v17  ;;  %v1163_v18 = vpop.f32.mrb[21].mxu0 }
 0x2ff   : > { %v1164_v19 = vadd.f32 %v3617_v11, %v1163_v18  ;;  %v2517_v8 = vpop.f32.mrb[22].mxu0  ;;  %v1249_v21 = vpack.c.bf16 %v1234_v15, %v1233_v13 }
 0x300   : > { %v1223_v22 = vadd.f32 %v3638_v53, %v1172_v63  ;;  %v1175_v24 = vadd.f32 %v2517_v8, %v2396_v20  ;;  %v1166_v2 = vpop.f32.mrb[23].mxu0 }
 0x301   : > { %v1221_v25 = vadd.f32 %v3638_v53, %v1164_v19  ;;  %v1167_v26 = vadd.f32 %v3619_v14, %v1166_v2  ;;  %2542 = vmatprep.mubr.bf16.mxu1 %v1249_v21  ;;  %2574 = vmatprep.mubr.bf16.mxu0 %v1249_v21 }
 0x302   : > { %v1224_v28 = vadd.f32 %v3638_v53, %v1175_v24  ;;  %2543 = vmatmul.mubr.bf16.vlgmr.msra.gmra.mrb[48].mxu1 %v1250_v16  ;;  %2575 = vmatmul.mubr.bf16.vlgmr.msra.gmra.mrb[32].mxu0 %v1250_v16  ;;  %v1239_v29 = vmax.f32 %v1223_v22, 0.0 }
 0x303   : > { %v1222_v17 = vadd.f32 %v3638_v53, %v1167_v26  ;;  %v1237_v30 = vmax.f32 %v1221_v25, 0.0 }
 0x304   : > { %v1240_v11 = vmax.f32 %v1224_v28, 0.0 }
 0x305   : > { %v1238_v31 = vmax.f32 %v1222_v17, 0.0  ;;  %v2520_v32 = vpop.f32.mrb[24].mxu0 }
 0x306   : > { %v1188_v33 = vadd.f32 %v2520_v32, %v2405_v35  ;;  %v1179_v20 = vpop.f32.mrb[25].mxu0  ;;  %v1252_v34 = vpack.c.bf16 %v1240_v11, %v1239_v29 }
 0x307   : > { %v1180_v37 = vadd.f32 %v3621_v23, %v1179_v20  ;;  %v2521_v38 = vpop.f32.mrb[26].mxu0  ;;  %v1251_v14 = vpack.c.bf16 %v1238_v31, %v1237_v30 }
 0x308   : > { %v1227_v39 = vadd.f32 %v3638_v53, %v1188_v33  ;;  %v1191_v40 = vadd.f32 %v2521_v38, %v3625_v36  ;;  %v1182_v43 = vpop.f32.mrb[27].mxu0  ;;  %v2864_v38 = vld [vmem:[#allocation13] sm:$0xff]  }
 0x309   : > { %v1225_v44 = vadd.f32 %v3638_v53, %v1180_v37  ;;  %v1183_v45 = vadd.f32 %v3623_v27, %v1182_v43  ;;  %2546 = vmatprep.mubr.bf16.mxu1 %v1251_v14  ;;  %2578 = vmatprep.mubr.bf16.mxu0 %v1251_v14  ;;  %v3167_v14 = vmov 0.0  }
 0x30a   : > { %v1228_v47 = vadd.f32 %v3638_v53, %v1191_v40  ;;  %2547 = vmatmul.mubr.bf16.gmra.mrb[52].mxu1 %v1252_v34  ;;  %2579 = vmatmul.mubr.bf16.gmra.mrb[36].mxu0 %v1252_v34  ;;  %v1243_v23 = vmax.f32 %v1227_v39, 0.0  ;;  %v2865_v39 = vld [vmem:[#allocation13 + $0x8] sm:$0xff]  }
 0x30b   : > { %v1226_v35 = vadd.f32 %v3638_v53, %v1183_v45  ;;  %v1241_v56 = vmax.f32 %v1225_v44, 0.0  ;;  %2622 = vmatprep.subr.bf16.mxu1 %v3167_v14 }
 0x30c   : > { %v1244_v52 = vmax.f32 %v1228_v47, 0.0  ;;  %2623 = vmatpush3.bf16.msra.mxu1 %v2864_v38 }
 0x30d   : > { %v1242_v57 = vmax.f32 %v1226_v35, 0.0  ;;  %v2524_v61 = vpop.f32.mrb[28].mxu0  ;;  %2624 = vmatprep.subr.bf16.mxu1 %v3167_v14 }
 0x30e   : > { %v1204_v36 = vadd.f32 %v2524_v61, %v3631_v46  ;;  %v1195_v62 = vpop.f32.mrb[29].mxu0  ;;  %v1254_v0 = vpack.c.bf16 %v1244_v52, %v1243_v23 }
 0x30f   : > { %v1196_v1 = vadd.f32 %v3627_v41, %v1195_v62  ;;  %v2525_v27 = vpop.f32.mrb[30].mxu0  ;;  %v1253_v3 = vpack.c.bf16 %v1242_v57, %v1241_v56 }
 0x310   : > { %v1231_v4 = vadd.f32 %v3638_v53, %v1204_v36  ;;  %v1207_v6 = vadd.f32 %v2525_v27, %v3633_v49  ;;  %v1198_v7 = vpop.f32.mrb[31].mxu0  ;;  %2625 = vmatpush3.bf16.msra.mxu1 %v2865_v39 }
 0x311   : > { %v1229_v9 = vadd.f32 %v3638_v53, %v1196_v1  ;;  %v1199_v10 = vadd.f32 %v3629_v42, %v1198_v7  ;;  %2550 = vmatprep.mubr.bf16.mxu1 %v1253_v3  ;;  %2582 = vmatprep.mubr.bf16.mxu0 %v1253_v3 }
 0x312   : > { %v1232_v12 = vadd.f32 %v3638_v53, %v1207_v6  ;;  %2551 = vmatmul.mubr.bf16.gmra.mrb[56].mxu1 %v1254_v0  ;;  %2583 = vmatmul.mubr.bf16.gmra.mrb[40].mxu0 %v1254_v0  ;;  %v1247_v41 = vmax.f32 %v1231_v4, 0.0 }
 0x313   : > { %v1230_v46 = vadd.f32 %v3638_v53, %v1199_v10  ;;  %v1245_v15 = vmax.f32 %v1229_v9, 0.0  ;;  %2626 = vmatprep.subr.bf16.mxu1 %v3167_v14 }
 0x314   : > { %v1248_v13 = vmax.f32 %v1232_v12, 0.0 }
 0x315   : > { %v1246_v5 = vmax.f32 %v1230_v46, 0.0 }
 0x316   : > { %v1256_v16 = vpack.c.bf16 %v1248_v13, %v1247_v41 }
 0x317   : > { %v1255_v63 = vpack.c.bf16 %v1246_v5, %v1245_v15 }
 0x319   : > { %2554 = vmatprep.mubr.bf16.mxu1 %v1255_v63  ;;  %2586 = vmatprep.mubr.bf16.mxu0 %v1255_v63 }
 0x31a   : > { %2555 = vmatmul.mubr.bf16.gmra.mrb[60].mxu1 %v1256_v16  ;;  %2587 = vmatmul.mubr.bf16.gmra.mrb[44].mxu0 %v1256_v16 }
 0x31b   : > { %2606 = vmatprep.mubr.bf16.mxu0 %v3583_v48  ;;  %2638 = vmatprep.mubr.msk.bf16.mxu1 %vm3168_vm0, %v3167_v14 }
 0x3d5   : > { %v2544_v42 = vpop.f32.mrb[48].mxu1 }
 0x3d6   : > { %v1355_v49 = vpop.f32.mrb[49].mxu1 }
 0x3d7   : > { %v2545_v18 = vpop.f32.mrb[50].mxu1 }
 0x3d8   : > { %v1580_v19 = vpack.c.bf16 %v2545_v18, %v2544_v42  ;;  %v1358_v8 = vpop.f32.mrb[51].mxu1 }
 0x3d9   : > { %v1579_v21 = vpack.c.bf16 %v1358_v8, %v1355_v49 }
 0x3db   : > { %2590 = vmatprep.subr.bf16.mxu0 %v1579_v21 }
 0x3dc   : > { %2591 = vmatpush3.bf16.msra.mxu0 %v1579_v21 }
 0x3dd   : > { %v2548_v53 = vpop.f32.mrb[52].mxu1  ;;  %2592 = vmatprep.subr.bf16.mxu0 %v1580_v19 }
 0x3de   : > { %v1371_v22 = vpop.f32.mrb[53].mxu1 }
 0x3df   : > { %v2549_v24 = vpop.f32.mrb[54].mxu1 }
 0x3e0   : > { %v1582_v2 = vpack.c.bf16 %v2549_v24, %v2548_v53  ;;  %v1374_v25 = vpop.f32.mrb[55].mxu1  ;;  %2593 = vmatpush3.bf16.msra.mxu0 %v1580_v19 }
 0x3e1   : > { %v1581_v26 = vpack.c.bf16 %v1374_v25, %v1371_v22 }
 0x3e3   : > { %2594 = vmatprep.subr.bf16.mxu0 %v1581_v26 }
 0x3e4   : > { %2595 = vmatpush3.bf16.msra.mxu0 %v1581_v26 }
 0x3e5   : > { %v2552_v28 = vpop.f32.mrb[56].mxu1  ;;  %2596 = vmatprep.subr.bf16.mxu0 %v1582_v2 }
 0x3e6   : > { %v1387_v48 = vpop.f32.mrb[57].mxu1 }
 0x3e7   : > { %v2553_v17 = vpop.f32.mrb[58].mxu1 }
 0x3e8   : > { %v1584_v29 = vpack.c.bf16 %v2553_v17, %v2552_v28  ;;  %v1390_v11 = vpop.f32.mrb[59].mxu1  ;;  %2597 = vmatpush3.bf16.msra.mxu0 %v1582_v2 }
 0x3e9   : > { %v1583_v30 = vpack.c.bf16 %v1390_v11, %v1387_v48 }
 0x3eb   : > { %2598 = vmatprep.subr.bf16.mxu0 %v1583_v30 }
 0x3ec   : > { %2599 = vmatpush3.bf16.msra.mxu0 %v1583_v30 }
 0x3ed   : > { %v2556_v31 = vpop.f32.mrb[60].mxu1  ;;  %2600 = vmatprep.subr.bf16.mxu0 %v1584_v29 }
 0x3ee   : > { %v1403_v32 = vpop.f32.mrb[61].mxu1 }
 0x3ef   : > { %v2557_v33 = vpop.f32.mrb[62].mxu1 }
 0x3f0   : > { %v1586_v20 = vpack.c.bf16 %v2557_v33, %v2556_v31  ;;  %v1406_v34 = vpop.f32.mrb[63].mxu1  ;;  %2601 = vmatpush3.bf16.msra.mxu0 %v1584_v29 }
 0x3f1   : > { %v1585_v37 = vpack.c.bf16 %v1406_v34, %v1403_v32 }
 0x3f3   : > { %2602 = vmatprep.subr.bf16.mxu0 %v1585_v37 }
 0x3f4   : > { %2603 = vmatpush3.bf16.msra.mxu0 %v1585_v37 }
 0x3f5   : > { %2604 = vmatprep.subr.bf16.mxu0 %v1586_v20 }
 0x3f8   : > { %2605 = vmatpush3.bf16.msra.mxu0 %v1586_v20 }
 0x3fb   : > { %2607 = vmatmul.mubr.bf16.vlgmr.msra.gmra.mrb[32].mxu0 %v3588_v50  ;;  %v2866_v50 = vld [vmem:[#allocation13 + $0x10] sm:$0xff]  }
 0x3fc   : > { %2610 = vmatprep.mubr.bf16.mxu0 %v3591_v51  ;;  %2627 = vmatpush3.bf16.msra.mxu1 %v2866_v50  ;;  %v2867_v51 = vld [vmem:[#allocation13 + $0x18] sm:$0xff]  }
 0x3fd   : > { %2628 = vmatprep.subr.bf16.mxu1 %v3167_v14 }
 0x400   : > { %2629 = vmatpush3.bf16.msra.mxu1 %v2867_v51 }
 0x401   : > { %2630 = vmatprep.subr.bf16.mxu1 %v3167_v14 }
 0x403   : > { %2611 = vmatmul.mubr.bf16.gmra.mrb[36].mxu0 %v3596_v54  ;;  %v2868_v54 = vld [vmem:[#allocation13 + $0x20] sm:$0xff]  }
 0x404   : > { %2614 = vmatprep.mubr.bf16.mxu0 %v3599_v55  ;;  %2631 = vmatpush3.bf16.msra.mxu1 %v2868_v54  ;;  %v2869_v55 = vld [vmem:[#allocation13 + $0x28] sm:$0xff]  }
 0x405   : > { %2632 = vmatprep.subr.bf16.mxu1 %v3167_v14 }
 0x408   : > { %2633 = vmatpush3.bf16.msra.mxu1 %v2869_v55 }
 0x409   : > { %2634 = vmatprep.subr.bf16.mxu1 %v3167_v14 }
 0x40b   : > { %2615 = vmatmul.mubr.bf16.gmra.mrb[40].mxu0 %v3604_v58  ;;  %v2870_v58 = vld [vmem:[#allocation13 + $0x30] sm:$0xff]  }
 0x40c   : > { %2618 = vmatprep.mubr.bf16.mxu0 %v3607_v59  ;;  %2635 = vmatpush3.bf16.msra.mxu1 %v2870_v58  ;;  %v2871_v59 = vld [vmem:[#allocation13 + $0x38] sm:$0xff]  }
 0x40d   : > { %2636 = vmatprep.subr.bf16.mxu1 %v3167_v14 }
 0x410   : > { %2637 = vmatpush3.bf16.msra.mxu1 %v2871_v59 }
 0x413   : > { %2619 = vmatmul.mubr.bf16.gmra.mrb[44].mxu0 %v3612_v60  ;;  %v3677_v60 = vld [vmem:[%s3774_s7] ss:$0 sm:$0xff] }
 0x4ce   : > { %v2608_v40 = vpop.f32.mrb[32].mxu0 }
 0x4cf   : > { %v1693_v43 = vadd.f32 %v2608_v40, %v3677_v60  ;;  %v1621_v44 = vpop.f32.mrb[33].mxu0 }
 0x4d0   : > { %v1691_v45 = vadd.f32 %v3677_v60, %v1621_v44  ;;  %v2609_v47 = vpop.f32.mrb[34].mxu0 }
 0x4d1   : > { %v1709_v35 = vmax.f32 %v1693_v43, 0.0  ;;  %v1694_v23 = vadd.f32 %v2609_v47, %v3677_v60  ;;  %v1624_v52 = vpop.f32.mrb[35].mxu0 }
 0x4d2   : > { %v1707_v56 = vmax.f32 %v1691_v45, 0.0  ;;  %v1692_v57 = vadd.f32 %v3677_v60, %v1624_v52 }
 0x4d3   : > { %v1735_v61 = vrot.slane %v1709_v35, 4  ;;  %v1710_v36 = vmax.f32 %v1694_v23, 0.0 }
 0x4d4   : > { %v1723_v62 = vrot.slane %v1707_v56, 4  ;;  %v1708_v0 = vmax.f32 %v1692_v57, 0.0 }
 0x4d5   : > { %v1736_v1 = vadd.f32 %v1735_v61, %v1709_v35  ;;  %v1741_v27 = vrot.slane %v1710_v36, 4 }
 0x4d6   : > { %v1724_v3 = vadd.f32 %v1723_v62, %v1707_v56  ;;  %v1729_v4 = vrot.slane %v1708_v0, 4  ;;  %v2612_v6 = vpop.f32.mrb[36].mxu0 }
 0x4d7   : > { %v1737_v7 = vrot.slane %v1736_v1, 2  ;;  %v1742_v9 = vadd.f32 %v1741_v27, %v1710_v36  ;;  %v1697_v10 = vadd.f32 %v2612_v6, %v3677_v60  ;;  %v1637_v12 = vpop.f32.mrb[37].mxu0 }
 0x4d8   : > { %v1725_v46 = vrot.slane %v1724_v3, 2  ;;  %v1730_v41 = vadd.f32 %v1729_v4, %v1708_v0  ;;  %v1695_v13 = vadd.f32 %v3677_v60, %v1637_v12  ;;  %v2613_v15 = vpop.f32.mrb[38].mxu0 }
 0x4d9   : > { %v1738_v5 = vadd.f32 %v1737_v7, %v1736_v1  ;;  %v1743_v16 = vrot.slane %v1742_v9, 2  ;;  %v1713_v63 = vmax.f32 %v1697_v10, 0.0  ;;  %v1698_v42 = vadd.f32 %v2613_v15, %v3677_v60  ;;  %v1640_v49 = vpop.f32.mrb[39].mxu0 }
 0x4da   : > { %v1726_v18 = vadd.f32 %v1725_v46, %v1724_v3  ;;  %v1731_v19 = vrot.slane %v1730_v41, 2  ;;  %v1711_v8 = vmax.f32 %v1695_v13, 0.0  ;;  %v1696_v21 = vadd.f32 %v3677_v60, %v1640_v49 }
 0x4db   : > { %v1739_v53 = vrot.slane %v1738_v5, 1  ;;  %v1744_v22 = vadd.f32 %v1743_v16, %v1742_v9  ;;  %v1759_v24 = vrot.slane %v1713_v63, 4  ;;  %v1714_v2 = vmax.f32 %v1698_v42, 0.0 }
 0x4dc   : > { %v1727_v25 = vrot.slane %v1726_v18, 1  ;;  %v1732_v26 = vadd.f32 %v1731_v19, %v1730_v41  ;;  %v1747_v28 = vrot.slane %v1711_v8, 4  ;;  %v1712_v48 = vmax.f32 %v1696_v21, 0.0 }
 0x4dd   : > { %v1740_v17 = vadd.f32 %v1739_v53, %v1738_v5  ;;  %v1745_v29 = vrot.slane %v1744_v22, 1  ;;  %v1760_v11 = vadd.f32 %v1759_v24, %v1713_v63  ;;  %v1765_v30 = vrot.slane %v1714_v2, 4 }
 0x4de   : > { %v1728_v31 = vadd.f32 %v1727_v25, %v1726_v18  ;;  %v1733_v32 = vrot.slane %v1732_v26, 1  ;;  %v1748_v33 = vadd.f32 %v1747_v28, %v1711_v8  ;;  %v1753_v20 = vrot.slane %v1712_v48, 4  ;;  %v2616_v34 = vpop.f32.mrb[40].mxu0 }
 0x4df   : > { %v1821_v37 = vmul.f32 0.125, %v1740_v17  ;;  %v1746_v38 = vadd.f32 %v1745_v29, %v1744_v22  ;;  %v1761_v14 = vrot.slane %v1760_v11, 2  ;;  %v1766_v39 = vadd.f32 %v1765_v30, %v1714_v2  ;;  %v1653_v50 = vpop.f32.mrb[41].mxu0 }
 0x4e0   : > { %v1819_v51 = vmul.f32 0.125, %v1728_v31  ;;  %v1734_v54 = vadd.f32 %v1733_v32, %v1732_v26  ;;  %v1749_v55 = vrot.slane %v1748_v33, 2  ;;  %v1754_v58 = vadd.f32 %v1753_v20, %v1712_v48  ;;  %v2617_v59 = vpop.f32.mrb[42].mxu0 }
 0x4e1   : > { %v1837_v40 = vpack.c.bf16 %v1821_v37, %v1821_v37  ;;  %v1822_v43 = vmul.f32 0.125, %v1746_v38  ;;  %v1762_v44 = vadd.f32 %v1761_v14, %v1760_v11  ;;  %v1767_v45 = vrot.slane %v1766_v39, 2  ;;  %v1656_v47 = vpop.f32.mrb[43].mxu0 }
 0x4e2   : > { %v1835_v35 = vpack.c.bf16 %v1819_v51, %v1819_v51  ;;  %v1820_v23 = vmul.f32 0.125, %v1734_v54  ;;  %v1750_v52 = vadd.f32 %v1749_v55, %v1748_v33  ;;  %v1755_v56 = vrot.slane %v1754_v58, 2 }
 0x4e3   : > { %v1838_v57 = vpack.c.bf16 %v1822_v43, %v1822_v43  ;;  %v1763_v61 = vrot.slane %v1762_v44, 1  ;;  %v1768_v36 = vadd.f32 %v1767_v45, %v1766_v39  ;;  %v1892_v62 = vunpack.c.l.b16 %v1837_v40 }
 0x4e4   : > { %v1836_v0 = vpack.c.bf16 %v1820_v23, %v1820_v23  ;;  %v1751_v1 = vrot.slane %v1750_v52, 1  ;;  %v1756_v27 = vadd.f32 %v1755_v56, %v1754_v58  ;;  %v1890_v3 = vunpack.c.l.b16 %v1835_v35 }
 0x4e5   : > { %v1764_v4 = vadd.f32 %v1763_v61, %v1762_v44  ;;  %v1769_v6 = vrot.slane %v1768_v36, 1  ;;  %v1701_v7 = vadd.f32 %v2616_v34, %v3677_v60  ;;  %v1699_v46 = vadd.f32 %v3677_v60, %v1653_v50 }
 0x4e6   : > { %v1891_v9 = vunpack.c.l.b16 %v1836_v0  ;;  %v1752_v10 = vadd.f32 %v1751_v1, %v1750_v52  ;;  %v1757_v12 = vrot.slane %v1756_v27, 1  ;;  %v2620_v41 = vpop.f32.mrb[44].mxu0  ;;  %v1893_v13 = vunpack.c.l.b16 %v1838_v57 }
 0x4e7   : > { %v3689_v15 = vmul.f32 0.125, %v1764_v4  ;;  %v1717_v5 = vmax.f32 %v1701_v7, 0.0  ;;  %v1702_v16 = vadd.f32 %v2617_v59, %v3677_v60  ;;  %v1669_v63 = vpop.f32.mrb[45].mxu0  ;;  %v1715_v19 = vmax.f32 %v1699_v46, 0.0 }
 0x4e8   : > { %v1907_v42 = vsel %vm1906_vm1, %v1891_v9, %v1890_v3  ;;  %v1823_v49 = vmul.f32 0.125, %v1752_v10  ;;  %v1758_v18 = vadd.f32 %v1757_v12, %v1756_v27  ;;  %v2621_v8 = vpop.f32.mrb[46].mxu0  ;;  %v1770_v53 = vadd.f32 %v1769_v6, %v1768_v36 }
 0x4e9   : > { %v1909_v21 = vsel %vm1908_vm2, %v1892_v62, %v1907_v42  ;;  %v1783_v22 = vrot.slane %v1717_v5, 4  ;;  %v1672_v24 = vpop.f32.mrb[47].mxu0  ;;  %v1771_v28 = vrot.slane %v1715_v19, 4  ;;  %v1841_v48 = vpack.c.bf16 %v3689_v15, %v3689_v15 }
 0x4ea   : > { %v1839_v2 = vpack.c.bf16 %v1823_v49, %v1823_v49  ;;  %v1911_v25 = vsel %vm1910_vm3, %v1893_v13, %v1909_v21  ;;  %v1824_v26 = vmul.f32 0.125, %v1758_v18  ;;  %v1718_v29 = vmax.f32 %v1702_v16, 0.0 }
 0x4eb   : > { %v1784_v17 = vadd.f32 %v1783_v22, %v1717_v5  ;;  %v1772_v31 = vadd.f32 %v1771_v28, %v1715_v19  ;;  %v1700_v32 = vadd.f32 %v3677_v60, %v1656_v47  ;;  %v1826_v33 = vmul.f32 0.125, %v1770_v53 }
 0x4ec   : > { %v1894_v11 = vunpack.c.l.b16 %v1839_v2  ;;  %v1840_v30 = vpack.c.bf16 %v1824_v26, %v1824_v26  ;;  %v1789_v34 = vrot.slane %v1718_v29, 4  ;;  %v1705_v37 = vadd.f32 %v2620_v41, %v3677_v60 }
 0x4ed   : > { %v1785_v20 = vrot.slane %v1784_v17, 2  ;;  %v1773_v39 = vrot.slane %v1772_v31, 2  ;;  %v1716_v50 = vmax.f32 %v1700_v32, 0.0  ;;  %v1703_v58 = vadd.f32 %v3677_v60, %v1669_v63 }
 0x4ee   : > { %v1913_v38 = vsel %vm1912_vm4, %v1894_v11, %v1911_v25  ;;  %v1895_v14 = vunpack.c.l.b16 %v1840_v30  ;;  %v1790_v54 = vadd.f32 %v1789_v34, %v1718_v29  ;;  %v1721_v55 = vmax.f32 %v1705_v37, 0.0 }
 0x4ef   : > { %v1786_v51 = vadd.f32 %v1785_v20, %v1784_v17  ;;  %v1774_v40 = vadd.f32 %v1773_v39, %v1772_v31  ;;  %v1777_v43 = vrot.slane %v1716_v50, 4  ;;  %v1706_v44 = vadd.f32 %v2621_v8, %v3677_v60 }
 0x4f0   : > { %v1915_v59 = vsel %vm1914_vm5, %v1895_v14, %v1913_v38  ;;  %v1791_v47 = vrot.slane %v1790_v54, 2  ;;  %v1807_v35 = vrot.slane %v1721_v55, 4  ;;  %v1719_v23 = vmax.f32 %v1703_v58, 0.0 }
 0x4f1   : > { %v1787_v45 = vrot.slane %v1786_v51, 1  ;;  %v1775_v52 = vrot.slane %v1774_v40, 1  ;;  %v1778_v56 = vadd.f32 %v1777_v43, %v1716_v50  ;;  %v1722_v57 = vmax.f32 %v1706_v44, 0.0 }
 0x4f2   : > { %v1704_v61 = vadd.f32 %v3677_v60, %v1672_v24  ;;  %v1842_v36 = vpack.c.bf16 %v1826_v33, %v1826_v33  ;;  %v1792_v62 = vadd.f32 %v1791_v47, %v1790_v54  ;;  %v1808_v0 = vadd.f32 %v1807_v35, %v1721_v55 }
 0x4f3   : > { %v1795_v1 = vrot.slane %v1719_v23, 4  ;;  %v1776_v27 = vadd.f32 %v1775_v52, %v1774_v40  ;;  %v1779_v3 = vrot.slane %v1778_v56, 2  ;;  %v1813_v4 = vrot.slane %v1722_v57, 4 }
 0x4f4   : > { %v1720_v6 = vmax.f32 %v1704_v61, 0.0  ;;  %v1788_v7 = vadd.f32 %v1787_v45, %v1786_v51  ;;  %v1793_v9 = vrot.slane %v1792_v62, 1  ;;  %v1809_v10 = vrot.slane %v1808_v0, 2 }
 0x4f5   : > { %v1796_v12 = vadd.f32 %v1795_v1, %v1719_v23  ;;  %v1780_v46 = vadd.f32 %v1779_v3, %v1778_v56  ;;  %v1814_v41 = vadd.f32 %v1813_v4, %v1722_v57  ;;  %v1827_v15 = vmul.f32 0.125, %v1776_v27  ;;  %v2275_v4 = vld [vmem:[%s3816_s22] ss:$0 sm:$0xff] }
 0x4f6   : > { %v1801_v13 = vrot.slane %v1720_v6, 4  ;;  %v1794_v5 = vadd.f32 %v1793_v9, %v1792_v62  ;;  %v1810_v16 = vadd.f32 %v1809_v10, %v1808_v0  ;;  %v1896_v63 = vunpack.c.l.b16 %v1841_v48 }
 0x4f7   : > { %v1797_v60 = vrot.slane %v1796_v12, 2  ;;  %v1781_v42 = vrot.slane %v1780_v46, 1  ;;  %v1815_v49 = vrot.slane %v1814_v41, 2  ;;  %v1897_v19 = vunpack.c.l.b16 %v1842_v36 }
 0x4f8   : > { %v1802_v18 = vadd.f32 %v1801_v13, %v1720_v6  ;;  %v1829_v8 = vmul.f32 0.125, %v1788_v7  ;;  %v1811_v21 = vrot.slane %v1810_v16, 1  ;;  %v1830_v22 = vmul.f32 0.125, %v1794_v5 }
 0x4f9   : > { %v1798_v53 = vadd.f32 %v1797_v60, %v1796_v12  ;;  %v1782_v24 = vadd.f32 %v1781_v42, %v1780_v46  ;;  %v1816_v2 = vadd.f32 %v1815_v49, %v1814_v41  ;;  %v1843_v26 = vpack.c.bf16 %v1827_v15, %v1827_v15 }
 0x4fa   : > { %v1803_v25 = vrot.slane %v1802_v18, 2  ;;  %v1812_v28 = vadd.f32 %v1811_v21, %v1810_v16  ;;  %v1917_v29 = vsel %vm1916_vm6, %v1896_v63, %v1915_v59  ;;  %v1845_v32 = vpack.c.bf16 %v1829_v8, %v1829_v8 }
 0x4fb   : > { %v1799_v17 = vrot.slane %v1798_v53, 1  ;;  %v1828_v11 = vmul.f32 0.125, %v1782_v24  ;;  %v1817_v30 = vrot.slane %v1816_v2, 1  ;;  %v1919_v48 = vsel %vm1918_vm7, %v1897_v19, %v1917_v29 }
 0x4fc   : > { %v1804_v31 = vadd.f32 %v1803_v25, %v1802_v18  ;;  %v1846_v20 = vpack.c.bf16 %v1830_v22, %v1830_v22  ;;  %v1833_v14 = vmul.f32 0.125, %v1812_v28  ;;  %v1898_v50 = vunpack.c.l.b16 %v1843_v26 }
 0x4fd   : > { %v1800_v33 = vadd.f32 %v1799_v17, %v1798_v53  ;;  %v1844_v34 = vpack.c.bf16 %v1828_v11, %v1828_v11  ;;  %v1818_v37 = vadd.f32 %v1817_v30, %v1816_v2  ;;  %v1900_v58 = vunpack.c.l.b16 %v1845_v32 }
 0x4fe   : > { %v1805_v38 = vrot.slane %v1804_v31, 1  ;;  %v1901_v59 = vunpack.c.l.b16 %v1846_v20  ;;  %v1849_v47 = vpack.c.bf16 %v1833_v14, %v1833_v14 }
 0x4ff   : > { %v1831_v39 = vmul.f32 0.125, %v1800_v33  ;;  %v1899_v51 = vunpack.c.l.b16 %v1844_v34  ;;  %v1834_v54 = vmul.f32 0.125, %v1818_v37 }
 0x500   : > { %v1806_v55 = vadd.f32 %v1805_v38, %v1804_v31  ;;  %v1904_v36 = vunpack.c.l.b16 %v1849_v47 }
 0x501   : > { %v1847_v40 = vpack.c.bf16 %v1831_v39, %v1831_v39  ;;  %v1920_v43 = vsel %vm1906_vm1, %v1899_v51, %v1898_v50  ;;  %v1850_v52 = vpack.c.bf16 %v1834_v54, %v1834_v54 }
 0x502   : > { %v1832_v44 = vmul.f32 0.125, %v1806_v55  ;;  %v1921_v45 = vsel %vm1908_vm2, %v1900_v58, %v1920_v43 }
 0x503   : > { %v1902_v35 = vunpack.c.l.b16 %v1847_v40  ;;  %v1922_v23 = vsel %vm1910_vm3, %v1901_v59, %v1921_v45  ;;  %v1905_v62 = vunpack.c.l.b16 %v1850_v52 }
 0x504   : > { %v1848_v56 = vpack.c.bf16 %v1832_v44, %v1832_v44 }
 0x505   : > { %v1923_v57 = vsel %vm1912_vm4, %v1902_v35, %v1922_v23 }
 0x506   : > { %v1903_v61 = vunpack.c.l.b16 %v1848_v56 }
 0x508   : > { %v1924_v0 = vsel %vm1914_vm5, %v1903_v61, %v1923_v57 }
 0x509   : > { %v1925_v1 = vsel %vm1916_vm6, %v1904_v36, %v1924_v0 }
 0x50a   : > { %v1926_v27 = vsel %vm1918_vm7, %v1905_v62, %v1925_v1 }
 0x50b   : > { %v1927_v3 = vpack.c.b16 %v1926_v27, %v1919_v48 }
 0x50d   : > { %2639 = vmatmul.mubr.bf16.vlgmr.msra.gmra.mrb[64].mxu1 %v1927_v3 }
 0x5e0   : > { %v2011_v6 = vpop.f32.mrb[64].mxu1 }
 0x5e1   : > { %v2012_v7 = vadd.f32 %v2275_v4, %v2011_v6  ;;  %v2640_v9 = vpop.f32.mrb[65].mxu1 }
 0x5e2   : > { %v2014_v10 = vpop.f32.mrb[66].mxu1 }
 0x5e3   : > { %2018 = vst [vmem:[%s490_s25] sm:$0xff] %v2012_v7  ;;  %v2015_v12 = vadd.f32 %v2275_v4, %v2014_v10  ;;  %v2641_v46 = vpop.f32.mrb[67].mxu1 }
 0x5e5   : > { %2019 = vst [vmem:[%s490_s25 + $0x8] sm:$0xff] %v2015_v12 }
 0x5e6   : > { %3085 = shalt.err (!%p3082_p8)
}
 0x5e7   : > { %s3086_s18 = scalar_lea.hbm %s3723_s3, 256  ;;  %s3090_s26 = scalar_lea.hbm %s3817_s30, 512 }
 0x5e8   : > { %p3087_p11 = scmp.ne.s32.totalorder %s3723_s3, %s3086_s18  ;;  %p3091_p1 = scmp.lt.u32.totalorder %s3723_s3, %s3817_s30 }
 0x5e9   : > { %p3092_p13 = scmp.lt.u32.totalorder %s3090_s26, %s3086_s18  ;;  %p3094_p7 = scmp.lt.u32.totalorder %s3086_s18, %s3723_s3 }
 0x5ea   : > { %p3088_p3 = pnand %p3087_p11, %p3818_p2 }
 0x5eb   : > { %p3093_p0 = por %p3092_p13, %p3091_p1 }
 0x5ec   : > { %p3089_p12 = pneg %p3088_p3 }
 0x5ed   : > { %p3095_p6 = por %p3094_p7, %p3093_p0 }
 0x5ef   : > { %p3096_p10 = pnand %p3095_p6, %p3089_p12 }
 0x5f1   : > { %3099 = shalt.err (!%p3096_p10)
}
 0x5f2   : > { %s3170_s22 = smov 128   ;;  %s3171_s25 = smov 8  }
 0x5f3   : > { %2698 = dma.vmem_to_hbm [thread:$0]  (%p3818_p2), %s3718_s8, 256, %s3723_s3, %s2021_s6, %s3170_s22, %s3170_s22, %s3171_s25  }
 0x5f4 PF: > { %s2049_s17 = sand.u32 1, %s3142_s13   ;;  %p3819_p5 = scmp.ne.s32.totalorder %s3803_s12, 0 }
 0x5f5   : > { %p3820_p9 = scmp.ge.s32.totalorder %s3154_s16, 2  ;;  %s2050_s21 = scalar_lea.sflag [#allocation4], %s2049_s17 }
 0x5f7   : > { %p2724_p4 = pnand %p3820_p9, %p3819_p5 }
 0x5f9   : > { %3137 = dma.done.wait (!%p2724_p4), %s2050_s21, 256  }
 0x5fa   : > { %3139 = vsyncadd (!%p2724_p4), %s2050_s21, 4294967040  ;;  %p28_p8 = scmp.ge.s32.totalorder %s3400_s11, 4   ;;  %s3821_s13 = smov %s3146_s14 }
 0x5fb   : > { %s3822_s14 = smov %s3150_s15  ;;  %s3823_s15 = smov %s3412_s10 }
 0x5fc   : > { %s3824_s16 = smov %s3400_s11  ;;  %30 = sbr.rel (!%p28_p8) target bundleno = 18 (0x12), region = 138 }
 0x603   :  { %2055 = vsyncpa [#allocation3], 1 }
 0x604   :  { %2057 = vsyncpa [#allocation3 + $0x1], 1 }
 0x605   :  { %2058 = vsyncpa [#allocation6], 1 }
 0x606   :  { %2060 = vsyncpa [#allocation6 + $0x1], 1 }
 0x607   :  { %2061 = vsyncpa [#allocation9], 1 }
 0x608   :  { %2062 = vsyncpa [#allocation12], 1 }
 0x609   :  { %2063 = vsyncpa [#allocation4], 1 }
 0x60a   :  { %2065 = vsyncpa [#allocation4 + $0x1], 1 }

</bundles_post_ra>
